<compile_context>
chip_gen: v7x
topology: tpu7x:2x2x1
jax: 0.10.0
libtpu: 0.0.40
codegen_flags: <defaults>
</compile_context>

<pallas_src>
import jax
import jax.numpy as jnp
from jax import lax
from jax.experimental import pallas as pl
from jax.experimental.pallas import tpu as pltpu

EPS = 1e-5  # nn.BatchNorm2d default


def _pick_row_tile(H, W, Cin, Cpad, in_item, out_item, budget_bytes):
    """Largest output-row tile whose double-buffered blocks + temps fit the budget."""
    K9 = 9 * Cin
    cands = [t for t in (512, 256, 128, 64, 32, 16, 8, 4, 2, 1) if t <= H] or [H]
    for th in cands:
        m = th * W
        need = (
            2 * (th + 2) * (W + 2) * Cin * in_item   # halo input block, double-buffered
            + 2 * K9 * Cpad * in_item                # weight block (grid-invariant, 2 bufs allocated)
            + 2 * m * Cpad * out_item                # output block, double-buffered (phase 2)
            + m * K9 * in_item                       # in-kernel patch matrix
            + 2 * m * Cpad * 4                       # f32 accumulator + elementwise temps (margin)
        )
        if need <= budget_bytes:
            return th
    return cands[-1]


def unit_forward(x_nchw, w_oihw, bias, gamma, beta, *, mxu_dtype=None):
    """Forward of Unit. x_nchw: (N, Cin, H, W). Returns (N, Cout, H, W)."""
    N, Cin, H, W = x_nchw.shape
    Cout = w_oihw.shape[0]
    K9 = 9 * Cin

    # Lane-dense channel padding; fill the 256-wide MXU N dim on v6e/v7x when Cout > 128.
    Cpad = ((Cout + 127) // 128) * 128
    if Cpad > 128:
        Cpad = ((Cout + 255) // 256) * 256

    in_dtype = mxu_dtype if mxu_dtype is not None else x_nchw.dtype
    out_dtype = x_nchw.dtype
    in_item = jnp.dtype(in_dtype).itemsize
    out_item = jnp.dtype(out_dtype).itemsize

    # Row tile sized against a v7x-safe VMEM budget (64 MiB physical; leave headroom).
    TH = _pick_row_tile(H, W, Cin, Cpad, in_item, out_item, budget_bytes=36 * 1024 * 1024)
    nh = -(-H // TH)
    Hpad = nh * TH
    M_tile = TH * W

    # ---- wrapper-side glue: halo-tiled padded NHWC view (no 9x im2col in HBM) ------
    x_nhwc = jnp.transpose(x_nchw, (0, 2, 3, 1))
    x_pad = jnp.pad(x_nhwc, ((0, 0), (1, 1), (1, 1), (0, 0)))
    if Hpad > H:
        x_pad = jnp.pad(x_pad, ((0, 0), (0, Hpad - H), (0, 0), (0, 0)))
    # (N, nh, TH+2, W+2, Cin): 2-row halo duplicated per tile (<= ~2/TH overhead).
    x_halo = jnp.stack([x_pad[:, j * TH:j * TH + TH + 2] for j in range(nh)], axis=1)
    x_halo = x_halo.reshape(N * nh, TH + 2, W + 2, Cin).astype(in_dtype)

    # OIHW -> (kh, kw, ci, co) -> (9*Cin, Cout), zero-padded to Cpad lanes.
    w2 = jnp.transpose(w_oihw, (2, 3, 1, 0)).reshape(K9, Cout)
    w2 = jnp.pad(w2, ((0, 0), (0, Cpad - Cout))).astype(in_dtype)
    bias_p = jnp.pad(bias.astype(jnp.float32), (0, Cpad - Cout))
    gamma_p = jnp.pad(gamma.astype(jnp.float32), (0, Cpad - Cout))
    beta_p = jnp.pad(beta.astype(jnp.float32), (0, Cpad - Cout))

    # ---- kernels (close over static tile sizes) --------------------------------------
    def conv_tile(x_ref, w_ref):
        # x_ref block: (1, TH+2, W+2, Cin). Build the 9 taps in VMEM and do ONE
        # K=9*Cin MXU matmul (f32 accumulate). No bias (folded into the BN shift).
        slab = x_ref[0]                                       # (TH+2, W+2, Cin)
        taps = [slab[kh:kh + TH, kw:kw + W, :]                # (TH, W, Cin) each
                for kh in range(3) for kw in range(3)]
        patches = jnp.concatenate(taps, axis=-1)              # (TH, W, 9*Cin)
        patches = patches.reshape(M_tile, K9)                 # merge leading dims
        return jnp.dot(patches, w_ref[...], preferred_element_type=jnp.float32)

    def conv_stats_kernel(x_ref, w_ref, stats_ref):
        y = conv_tile(x_ref, w_ref)                           # raw conv (no bias), f32
        j = pl.program_id(1)
        valid_rows = jnp.minimum(TH, H - j * TH) * W          # mask H-padding out of stats
        ridx = lax.broadcasted_iota(jnp.int32, (M_tile, 1), 0)
        y = jnp.where(ridx < valid_rows, y, 0.0)
        stats_ref[0, 0:1, :] = jnp.sum(y, axis=0, keepdims=True)
        stats_ref[0, 1:2, :] = jnp.sum(y * y, axis=0, keepdims=True)

    def conv_bn_relu_kernel(x_ref, w_ref, scale_ref, shift_ref, o_ref):
        y = conv_tile(x_ref, w_ref)                           # recompute conv (no HBM intermediate)
        y = y * scale_ref[...] + shift_ref[...]
        o_ref[0] = jnp.maximum(y, 0.0).astype(o_ref.dtype)

    cparams = pltpu.CompilerParams(
        dimension_semantics=("parallel", "parallel"),          # megacore split on v7x
        vmem_limit_bytes=48 * 1024 * 1024,                     # <= v7x's 64 MiB physical
    )

    x_spec = pl.BlockSpec((1, TH + 2, W + 2, Cin), lambda n, j: (n * nh + j, 0, 0, 0))
    # Grid-invariant weight block: index_map is constant so the pipeline skips the
    # re-fetch between steps.
    # TODO(synk): for large Cin, single-buffer it (pipeline_mode=pl.Buffered(1)) or
    #             stage it once in VMEM scratch to reclaim the second buffer.
    w_spec = pl.BlockSpec((K9, Cpad), lambda n, j: (0, 0))

    flops = 2 * (N * nh) * M_tile * K9 * Cpad
    halo_bytes = int(x_halo.size) * in_item
    w_bytes = int(w2.size) * in_item

    # ---- phase 1: fused im2col + conv matmul -> per-tile (sum, sumsq) only ----------
    stats = pl.pallas_call(
        conv_stats_kernel,
        out_shape=jax.ShapeDtypeStruct((N * nh, 2, Cpad), jnp.float32),
        grid=(N, nh),
        in_specs=[x_spec, w_spec],
        out_specs=pl.BlockSpec((1, 2, Cpad), lambda n, j: (n * nh + j, 0, 0)),
        compiler_params=cparams,
        cost_estimate=pl.CostEstimate(
            flops=flops, transcendentals=0,
            bytes_accessed=halo_bytes + w_bytes + N * nh * 2 * Cpad * 4),
    )(x_halo, w2)

    # ---- global BN(train) stats -> fused affine coefficients (tiny, wrapper) --------
    s = jnp.sum(stats, axis=0)                                 # (2, Cpad)
    count = float(N * H * W)                                   # true count (padding masked)
    mean_raw = s[0] / count                                    # mean of bias-free conv
    var = jnp.maximum(s[1] / count - mean_raw * mean_raw, 0.0) # biased variance (bias-invariant)
    scale = gamma_p * lax.rsqrt(var + EPS)
    # BN(conv + bias) = conv*scale + shift with shift = beta - mean_raw*scale
    # (bias folded: mean of conv+bias is mean_raw + bias).
    shift = beta_p - mean_raw * scale
    scale2 = scale.reshape(1, Cpad)
    shift2 = shift.reshape(1, Cpad)

    # ---- phase 2: recompute conv tile, fused BN affine + ReLU, lane-dense store -----
    out = pl.pallas_call(
        conv_bn_relu_kernel,
        out_shape=jax.ShapeDtypeStruct((N * nh, M_tile, Cpad), out_dtype),
        grid=(N, nh),
        in_specs=[x_spec, w_spec,
                  pl.BlockSpec((1, Cpad), lambda n, j: (0, 0)),
                  pl.BlockSpec((1, Cpad), lambda n, j: (0, 0))],
        out_specs=pl.BlockSpec((1, M_tile, Cpad), lambda n, j: (n * nh + j, 0, 0)),
        compiler_params=cparams,
        cost_estimate=pl.CostEstimate(
            flops=flops, transcendentals=0,
            bytes_accessed=halo_bytes + w_bytes + N * nh * M_tile * Cpad * out_item),
    )(x_halo, w2, scale2, shift2)

    out_nhwc = out.reshape(N, Hpad, W, Cpad)[:, :H, :, :Cout]
    return jnp.transpose(out_nhwc, (0, 3, 1, 2))               # back to NCHW


def unit_reference(x_nchw, w_oihw, bias, gamma, beta):
    """Pure-JAX reference (mirrors PyTorch Conv2d + BatchNorm2d(train) + ReLU)."""
    y = lax.conv_general_dilated(
        x_nchw.astype(jnp.float32), w_oihw.astype(jnp.float32),
        window_strides=(1, 1), padding=((1, 1), (1, 1)),
        dimension_numbers=("NCHW", "OIHW", "NCHW"))
    y = y + bias.reshape(1, -1, 1, 1)
    mean = jnp.mean(y, axis=(0, 2, 3), keepdims=True)
    var = jnp.mean((y - mean) ** 2, axis=(0, 2, 3), keepdims=True)
    y = (y - mean) * lax.rsqrt(var + EPS)
    y = y * gamma.reshape(1, -1, 1, 1) + beta.reshape(1, -1, 1, 1)
    return jnp.maximum(y, 0.0)


if __name__ == "__main__":
    N, Cin, Cout, H, W = 2, 4, 8, 16, 16

    key = jax.random.PRNGKey(0)
    kx, kw, kb, kg, kbe = jax.random.split(key, 5)
    x = jax.random.normal(kx, (N, Cin, H, W), dtype=jnp.float32)
    w = jax.random.normal(kw, (Cout, Cin, 3, 3), dtype=jnp.float32) * 0.1
    b = jax.random.normal(kb, (Cout,), dtype=jnp.float32) * 0.1
    gamma = 1.0 + 0.1 * jax.random.normal(kg, (Cout,), dtype=jnp.float32)
    beta = 0.1 * jax.random.normal(kbe, (Cout,), dtype=jnp.float32)

    out = jax.block_until_ready(unit_forward(x, w, b, gamma, beta))
    ref = unit_reference(x, w, b, gamma, beta)

    assert out.shape == (N, Cout, H, W)
    assert jnp.allclose(out, ref, atol=2e-3, rtol=2e-3), float(jnp.max(jnp.abs(out - ref)))

    print("KERNEL_OK")
</pallas_src>

<mosaic_0001>
module attributes {stable_mosaic.version = 11 : i64} {
  func.func @conv_stats_kernel(%arg0: i32, %arg1: i32, %arg2: memref<1x18x18x4xf32, #tpu.memory_space<vmem>>, %arg3: memref<36x128xf32, #tpu.memory_space<vmem>>, %arg4: memref<1x2x128xf32, #tpu.memory_space<vmem>>) attributes {dimension_semantics = [#tpu.dimension_semantics<parallel>, #tpu.dimension_semantics<parallel>], iteration_bounds = array<i64: 2, 1>, scalar_prefetch = 0 : i64, scratch_operands = 0 : i64, tpu.core_type = #tpu.core_type<tc>, window_params = [{transform_indices = @transform_0, window_bounds = array<i64: 1, 18, 18, 4>}, {pipeline_mode = #tpu.pipeline_mode<synchronous>, transform_indices = @transform_1, window_bounds = array<i64: 36, 128>}, {transform_indices = @transform_2, window_bounds = array<i64: 1, 2, 128>}]} {
    %c0 = arith.constant 0 : index
    %c0_0 = arith.constant 0 : index
    %c0_1 = arith.constant 0 : index
    %c0_2 = arith.constant 0 : index
    %0 = vector.load %arg2[%c0, %c0_0, %c0_1, %c0_2] : memref<1x18x18x4xf32, #tpu.memory_space<vmem>>, vector<1x18x18x4xf32>
    %1 = vector.shape_cast %0 : vector<1x18x18x4xf32> to vector<18x18x4xf32>
    %2 = vector.extract_strided_slice %1 {offsets = [0, 0, 0], sizes = [16, 16, 4], strides = [1, 1, 1]} : vector<18x18x4xf32> to vector<16x16x4xf32>
    %3 = vector.extract_strided_slice %1 {offsets = [0, 1, 0], sizes = [16, 16, 4], strides = [1, 1, 1]} : vector<18x18x4xf32> to vector<16x16x4xf32>
    %4 = vector.extract_strided_slice %1 {offsets = [0, 2, 0], sizes = [16, 16, 4], strides = [1, 1, 1]} : vector<18x18x4xf32> to vector<16x16x4xf32>
    %5 = vector.extract_strided_slice %1 {offsets = [1, 0, 0], sizes = [16, 16, 4], strides = [1, 1, 1]} : vector<18x18x4xf32> to vector<16x16x4xf32>
    %6 = vector.extract_strided_slice %1 {offsets = [1, 1, 0], sizes = [16, 16, 4], strides = [1, 1, 1]} : vector<18x18x4xf32> to vector<16x16x4xf32>
    %7 = vector.extract_strided_slice %1 {offsets = [1, 2, 0], sizes = [16, 16, 4], strides = [1, 1, 1]} : vector<18x18x4xf32> to vector<16x16x4xf32>
    %8 = vector.extract_strided_slice %1 {offsets = [2, 0, 0], sizes = [16, 16, 4], strides = [1, 1, 1]} : vector<18x18x4xf32> to vector<16x16x4xf32>
    %9 = vector.extract_strided_slice %1 {offsets = [2, 1, 0], sizes = [16, 16, 4], strides = [1, 1, 1]} : vector<18x18x4xf32> to vector<16x16x4xf32>
    %10 = vector.extract_strided_slice %1 {offsets = [2, 2, 0], sizes = [16, 16, 4], strides = [1, 1, 1]} : vector<18x18x4xf32> to vector<16x16x4xf32>
    %11 = tpu.concatenate %2, %3, %4, %5, %6, %7, %8, %9, %10 in 2 : vector<16x16x4xf32>, vector<16x16x4xf32>, vector<16x16x4xf32>, vector<16x16x4xf32>, vector<16x16x4xf32>, vector<16x16x4xf32>, vector<16x16x4xf32>, vector<16x16x4xf32>, vector<16x16x4xf32> -> vector<16x16x36xf32>
    %12 = vector.shape_cast %11 : vector<16x16x36xf32> to vector<256x36xf32>
    %c0_3 = arith.constant 0 : index
    %c0_4 = arith.constant 0 : index
    %13 = vector.load %arg3[%c0_3, %c0_4] : memref<36x128xf32, #tpu.memory_space<vmem>>, vector<36x128xf32>
    %cst = arith.constant dense<0.000000e+00> : vector<256x128xf32>
    %14 = tpu.matmul %12, %13, %cst {dimension_numbers = #tpu.dot_dimension_numbers<[1], [0], [0], [1], [0, 0, 1, 1], [], []>} : vector<256x36xf32>, vector<36x128xf32>, vector<256x128xf32> -> vector<256x128xf32>
    %c16_i32 = arith.constant 16 : i32
    %15 = arith.muli %arg1, %c16_i32 : i32
    %c16_i32_5 = arith.constant 16 : i32
    %16 = arith.subi %c16_i32_5, %15 : i32
    %c16_i32_6 = arith.constant 16 : i32
    %17 = arith.minsi %c16_i32_6, %16 : i32
    %c16_i32_7 = arith.constant 16 : i32
    %18 = arith.muli %17, %c16_i32_7 : i32
    %19 = tpu.iota {dimensions = array<i32: 0>} : vector<256x1xi32>
    %20 = vector.broadcast %18 : i32 to vector<256x1xi32>
    %21 = arith.cmpi slt, %19, %20 : vector<256x1xi32>
    %cst_8 = arith.constant 0.000000e+00 : f32
    %22 = vector.shape_cast %21 : vector<256x1xi1> to vector<256x1xi1>
    %23 = vector.broadcast %22 : vector<256x1xi1> to vector<256x128xi1>
    %24 = vector.broadcast %cst_8 : f32 to vector<256x128xf32>
    %25 = arith.select %23, %14, %24 : vector<256x128xi1>, vector<256x128xf32>
    %cst_9 = arith.constant dense<0.000000e+00> : vector<128xf32>
    %26 = vector.multi_reduction <add>, %25, %cst_9 [0] : vector<256x128xf32> to vector<128xf32>
    %27 = vector.shape_cast %26 : vector<128xf32> to vector<1x128xf32>
    %c0_10 = arith.constant 0 : index
    %c0_11 = arith.constant 0 : index
    %c0_12 = arith.constant 0 : index
    %28 = vector.load %arg4[%c0_10, %c0_11, %c0_12] : memref<1x2x128xf32, #tpu.memory_space<vmem>>, vector<1x1x128xf32>
    %29 = vector.shape_cast %28 : vector<1x1x128xf32> to vector<1x128xf32>
    %30 = vector.shape_cast %27 : vector<1x128xf32> to vector<1x1x128xf32>
    tpu.vector_store %arg4[%c0_10, %c0_11, %c0_12], %30 {strides = array<i32>} : memref<1x2x128xf32, #tpu.memory_space<vmem>>, vector<1x1x128xf32>,
    %31 = arith.mulf %25, %25 : vector<256x128xf32>
    %cst_13 = arith.constant dense<0.000000e+00> : vector<128xf32>
    %32 = vector.multi_reduction <add>, %31, %cst_13 [0] : vector<256x128xf32> to vector<128xf32>
    %33 = vector.shape_cast %32 : vector<128xf32> to vector<1x128xf32>
    %c0_14 = arith.constant 0 : index
    %c1 = arith.constant 1 : index
    %c0_15 = arith.constant 0 : index
    %34 = vector.load %arg4[%c0_14, %c1, %c0_15] : memref<1x2x128xf32, #tpu.memory_space<vmem>>, vector<1x1x128xf32>
    %35 = vector.shape_cast %34 : vector<1x1x128xf32> to vector<1x128xf32>
    %36 = vector.shape_cast %33 : vector<1x128xf32> to vector<1x1x128xf32>
    tpu.vector_store %arg4[%c0_14, %c1, %c0_15], %36 {strides = array<i32>} : memref<1x2x128xf32, #tpu.memory_space<vmem>>, vector<1x1x128xf32>,
    return
  }
  func.func @transform_0(%arg0: i32, %arg1: i32) -> (i32, i32, i32, i32) {
    %c1_i32 = arith.constant 1 : i32
    %0 = arith.muli %arg0, %c1_i32 : i32
    %1 = arith.addi %0, %arg1 : i32
    %c0_i32 = arith.constant 0 : i32
    %c0_i32_0 = arith.constant 0 : i32
    %c0_i32_1 = arith.constant 0 : i32
    %c0_i32_2 = arith.constant 0 : i32
    return %1, %c0_i32, %c0_i32_0, %c0_i32_1 : i32, i32, i32, i32
  }
  func.func @transform_1(%arg0: i32, %arg1: i32) -> (i32, i32) {
    %c0_i32 = arith.constant 0 : i32
    %c0_i32_0 = arith.constant 0 : i32
    %c0_i32_1 = arith.constant 0 : i32
    return %c0_i32, %c0_i32_0 : i32, i32
  }
  func.func @transform_2(%arg0: i32, %arg1: i32) -> (i32, i32, i32) {
    %c1_i32 = arith.constant 1 : i32
    %0 = arith.muli %arg0, %c1_i32 : i32
    %1 = arith.addi %0, %arg1 : i32
    %c0_i32 = arith.constant 0 : i32
    %c0_i32_0 = arith.constant 0 : i32
    %c0_i32_1 = arith.constant 0 : i32
    return %1, %c0_i32, %c0_i32_0 : i32, i32, i32
  }
}

</mosaic_0001>

<bundles_post_ra>
// kernel: tpu_custom_call.1
= control target key start
LH: loop header
LB: loop body
LE: loop exit
PB: predicated region body
PF: predicated region fallthrough
CT: control target
= control target key end

     0   :  { %7 = vsyncpa [#allocation3], 0  ;;  %s4119_s0 = inlined_call_operand.vmem [shape: f32[2,18,18,4], index: 0, kind: input, shape index: {}]   ;;  %s4120_s1 = inlined_call_operand.vmem [shape: f32[36,128], index: 1, kind: input, shape index: {}]   ;;  %s4121_s2 = inlined_call_operand.hbm [shape: f32[2,2,128], index: 2, kind: output, shape index: {}]  }
   0x1   :  { %9 = vsyncpa [#allocation3 + $0x1], 0  ;;  %s2514_s9 = smov 0   ;;  %s2516_s10 = smov 0  }
   0x2   :  { %s2518_s11 = smov 0   ;;  %s2520_s12 = smov 0  }
   0x3   :  { %s2522_s13 = smov 0   ;;  %s2524_s14 = smov 0  }
   0x4 LB: > { %s2175_s15 = sadd.s32 4294967295, %s2488_s14   ;;  %s2176_s16 = sadd.s32 4294967294, %s2488_s14   ;;  %s2488_s14 = sphi %s2524_s14, %s15_s14   ;;  %s2484_s13 = sphi %s2522_s13, %s4339_s13   ;;  %s2480_s12 = sphi %s2520_s12, %s4338_s12   ;;  %s2476_s11 = sphi %s2518_s11, %s4337_s11   ;;  %s2472_s10 = sphi %s2516_s10, %s4336_s10   ;;  %s2468_s9 = sphi %s2514_s9, %s4335_s9  }
   0x5   : > { %s27_s17 = sadd.s32 1, %s2484_s13  ;;  %s85_s18 = sadd.s32 1, %s2476_s11 }
   0x6   : > { %p29_p0 = scmp.ge.s32.totalorder %s27_s17, 2  ;;  %p95_p1 = scmp.ne.s32.totalorder %s2476_s11, %s2472_s10 }
   0x7   : > { %p96_p2 = scmp.eq.s32.totalorder %s2175_s15, 1  ;;  %p101_p3 = scmp.ne.s32.totalorder %s2472_s10, %s2468_s9 }
   0x8   : > { %s4341_s17 = smov (%p29_p0, %s27_s17), 0  ;;  %p102_p5 = scmp.eq.s32.totalorder %s2176_s16, 1 }
   0x9   : > { %p2554_p4 = por %p96_p2, %p95_p1  ;;  %s82_s20 = ssub.s32 %s2484_s13, %s4341_s17 }
   0xa   : > { %p2179_p6 = scmp.ge.s32.totalorder %s2488_s14, 1  ;;  %p83_p7 = scmp.eq.s32.totalorder %s82_s20, 0 }
   0xb   : > { %p2561_p8 = por %p102_p5, %p101_p3  ;;  %p133_p9 = scmp.lt.s32.totalorder %s2488_s14, 3 }
   0xc   : > { %s2567_s22 = scalar_select %p83_p7, %s2476_s11, %s85_s18  }
   0xd   : > { %p134_p10 = pnand %p2179_p6, %p133_p9 }
   0xf   : > { %137 = sbr.rel (%p134_p10) target bundleno = 904 (0x388), region = 28 }
  0x16   : > { %p157_p11 = scmp.lt.s32.totalorder %s2480_s12, 1  ;;  %vm266_vm0 = vcmask 1046528   ;;  %s2490_s28 = smov 4   ;;  %vm443_vm1 = vcmask 1045504   ;;  %vm1588_vm2 = vcmask 1043456   ;;  %vm1222_vm3 = vcmask 31744  }
  0x17   : > { %s2491_s29 = smov 8   ;;  %s2492_s30 = smov 12   ;;  %vm1255_vm4 = vcmask 64512   ;;  %vm1288_vm5 = vcmask 97280   ;;  %vm1321_vm6 = vcmask 130048   ;;  %vm1354_vm7 = vcmask 162816  }
  0x18   : > { %s158_s23 = scalar_select %p157_p11, %s2480_s12, 1  ;;  %vm1387_vm8 = vcmask 195584   ;;  %vm1420_vm9 = vcmask 228352   ;;  %vm1453_vm10 = vcmask 261120   ;;  %vm1491_vm11 = vcmask 293888  }
  0x19   : > { %s2493_s3 = smov 16   ;;  %s2494_s8 = smov 20  }
  0x1a   : > { %s2328_s24 = smul.u32 432, %s158_s23  ;;  %s2495_s23 = smov 24  }
  0x1b   : > { %s2496_s26 = smov 28  }
  0x1c   : > { %s2574_s27 = scalar_lea.vmem %s4119_s0, %s2328_s24 }
  0x1d   : > { %v2577_v0 = vld [vmem:[%s2574_s27 + $0x18] sm:$0xff]  ;;  %v2580_v1 = vld [vmem:[%s2574_s27 + $0x20] sm:$0xff]  ;;  %v2588_v5 = vld [vmem:[%s2574_s27 + $0x8] sm:$0xff] }
  0x1e   : > { %v2583_v2 = vld [vmem:[%s2574_s27] sm:$0xff]  ;;  %v272_v3 = vrot.slane %v2577_v0, 1  ;;  %v273_v4 = vrot.slane %v2580_v1, 1  ;;  %v2592_v7 = vld [vmem:[%s2574_s27 + $0x28] sm:$0x3]  ;;  %v268_v8 = vrot.slane %v2588_v5, 1 }
  0x1f   : > { %4217 = vst [vmem:[#allocation5_spill] sm:$0xff] %v2583_v2  ;;  %v267_v6 = vrot.slane %v2583_v2, 1  ;;  %v275_v9 = vrot.slane %v2592_v7, 1  ;;  %v2597_v10 = vld [vmem:[%s2574_s27 + $0x10] sm:$0x3]  ;;  %v2600_v11 = vld [vmem:[%s2574_s27 + $0x38] sm:$0xff] }
  0x20   : > { %v2603_v12 = vsel %vm266_vm0, %v272_v3, %v273_v4  ;;  %v270_v13 = vrot.slane %v2597_v10, 1  ;;  %v2607_v14 = vld [vmem:[%s2574_s27 + $0x40] sm:$0x3]  ;;  %v2610_v15 = vld [vmem:[%s2574_s27 + $0x30] sm:$0xff]  ;;  %v278_v18 = vrot.slane %v2600_v11, 1  ;;  %v2630_v24 = vld [vmem:[%s2574_s27 + $0x48] sm:$0xff] }
  0x21   : > { %351 = vrot.lane.b32.xlu1 %v2603_v12, %s2490_s28  ;;  %v269_v16 = vsel %vm266_vm0, %v267_v6, %v268_v8  ;;  %v2617_v17 = vsel %vm266_vm0, %v273_v4, %v275_v9  ;;  %v280_v19 = vrot.slane %v2607_v14, 1  ;;  %v277_v21 = vrot.slane %v2610_v15, 1  ;;  %v2624_v22 = vld [vmem:[%s2574_s27 + $0x50] sm:$0xff]  ;;  %v2627_v23 = vld [vmem:[%s2574_s27 + $0x58] sm:$0x3]  ;;  %v2645_v30 = vld [vmem:[%s2574_s27 + $0x68] sm:$0xff] }
  0x22   : > { %347 = vrot.lane.b32.xlu0 %v269_v16, %s2490_s28  ;;  %v271_v20 = vsel %vm266_vm0, %v268_v8, %v270_v13  ;;  %v283_v26 = vrot.slane %v2624_v22, 1  ;;  %v285_v27 = vrot.slane %v2627_v23, 1  ;;  %v282_v29 = vrot.slane %v2630_v24, 1  ;;  %v2648_v31 = vld [vmem:[%s2574_s27 + $0x70] sm:$0x3]  ;;  %v2651_v32 = vld [vmem:[%s2574_s27 + $0x60] sm:$0xff] }
  0x23   : > { %v2636_v25 = vsel %vm266_vm0, %v278_v18, %v280_v19  ;;  %v2641_v28 = vsel %vm266_vm0, %v277_v21, %v278_v18  ;;  %v288_v34 = vrot.slane %v2645_v30, 1  ;;  %v290_v35 = vrot.slane %v2648_v31, 1  ;;  %v2667_v38 = vld [vmem:[%s2574_s27 + $0x80] sm:$0xff]  ;;  %v2670_v39 = vld [vmem:[%s2574_s27 + $0x88] sm:$0x3]  ;;  %v2673_v40 = vld [vmem:[%s2574_s27 + $0x78] sm:$0xff] }
  0x24   : > { %v2658_v33 = vsel %vm266_vm0, %v283_v26, %v285_v27  ;;  %v2663_v36 = vsel %vm266_vm0, %v282_v29, %v283_v26  ;;  %v287_v37 = vrot.slane %v2651_v32, 1  ;;  %v293_v42 = vrot.slane %v2667_v38, 1  ;;  %v2689_v46 = vld [vmem:[%s2574_s27 + $0x98] sm:$0xff]  ;;  %v2692_v47 = vld [vmem:[%s2574_s27 + $0xa0] sm:$0x3]  ;;  %v2695_v48 = vld [vmem:[%s2574_s27 + $0x90] sm:$0xff] }
  0x25   : > { %353 = vrot.lane.b32.xlu1 %v2617_v17, %s2490_s28  ;;  %4218 = vst [vmem:[#allocation6_spill] sm:$0xff] %v2658_v33  ;;  %v2680_v41 = vsel %vm266_vm0, %v288_v34, %v290_v35  ;;  %v295_v43 = vrot.slane %v2670_v39, 1  ;;  %v292_v45 = vrot.slane %v2673_v40, 1  ;;  %v298_v50 = vrot.slane %v2689_v46, 1  ;;  %v2711_v54 = vld [vmem:[%s2574_s27 + $0xb0] sm:$0xff]  ;;  %v2717_v56 = vld [vmem:[%s2574_s27 + $0xa8] sm:$0xff] }
  0x26   : > { %349 = vrot.lane.b32.xlu0 %v271_v20, %s2490_s28  ;;  %4219 = vst [vmem:[#allocation7_spill] sm:$0xff] %v2680_v41  ;;  %v2685_v44 = vsel %vm266_vm0, %v287_v37, %v288_v34  ;;  %v300_v51 = vrot.slane %v2692_v47, 1  ;;  %v297_v53 = vrot.slane %v2695_v48, 1  ;;  %v2714_v55 = vld [vmem:[%s2574_s27 + $0xb8] sm:$0x3]  ;;  %v303_v58 = vrot.slane %v2711_v54, 1 }
  0x27   : > { %4220 = vst [vmem:[#allocation8_spill] sm:$0xff] %v2685_v44  ;;  %v2702_v49 = vsel %vm266_vm0, %v293_v42, %v295_v43  ;;  %v2707_v52 = vsel %vm266_vm0, %v292_v45, %v293_v42  ;;  %v305_v59 = vrot.slane %v2714_v55, 1  ;;  %v302_v61 = vrot.slane %v2717_v56, 1  ;;  %v2733_v62 = vld [vmem:[%s2574_s27 + $0xc8] sm:$0xff]  ;;  %v2736_v63 = vld [vmem:[%s2574_s27 + $0xd0] sm:$0x3] }
  0x28   : > { %4221 = vst [vmem:[#allocation9_spill] sm:$0xff] %v2702_v49  ;;  %4222 = vst [vmem:[#allocation10_spill] sm:$0xff] %v2707_v52  ;;  %v2724_v57 = vsel %vm266_vm0, %v298_v50, %v300_v51  ;;  %v2729_v60 = vsel %vm266_vm0, %v297_v53, %v298_v50  ;;  %v2739_v3 = vld [vmem:[%s2574_s27 + $0xc0] sm:$0xff]  ;;  %v308_v6 = vrot.slane %v2733_v62, 1  ;;  %v310_v8 = vrot.slane %v2736_v63, 1  ;;  %v2761_v19 = vld [vmem:[%s2574_s27 + $0xd8] sm:$0xff] }
  0x29   : > { %357 = vrot.lane.b32.xlu1 %v2636_v25, %s2490_s28  ;;  %4223 = vst [vmem:[#allocation11_spill] sm:$0xff] %v2724_v57  ;;  %4224 = vst [vmem:[#allocation12_spill] sm:$0xff] %v2729_v60  ;;  %v2746_v4 = vsel %vm266_vm0, %v303_v58, %v305_v59  ;;  %v2751_v9 = vsel %vm266_vm0, %v302_v61, %v303_v58  ;;  %v307_v13 = vrot.slane %v2739_v3, 1  ;;  %v2755_v16 = vld [vmem:[%s2574_s27 + $0xe0] sm:$0xff]  ;;  %v2758_v18 = vld [vmem:[%s2574_s27 + $0xe8] sm:$0x3] }
  0x2a   : > { %355 = vrot.lane.b32.xlu0 %v2641_v28, %s2490_s28  ;;  %4225 = vst [vmem:[#allocation13_spill] sm:$0xff] %v2746_v4  ;;  %4226 = vst [vmem:[#allocation14_spill] sm:$0xff] %v2751_v9  ;;  %v2768_v20 = vsel %vm266_vm0, %v308_v6, %v310_v8  ;;  %v313_v21 = vrot.slane %v2755_v16, 1  ;;  %v315_v26 = vrot.slane %v2758_v18, 1  ;;  %v312_v29 = vrot.slane %v2761_v19, 1  ;;  %v2777_v34 = vld [vmem:[%s2574_s27 + $0xf8] sm:$0xff] }
  0x2b   : > { %4227 = vst [vmem:[#allocation15_spill] sm:$0xff] %v2768_v20  ;;  %v2773_v27 = vsel %vm266_vm0, %v307_v13, %v308_v6  ;;  %v2780_v35 = vld [vmem:[%s2574_s27 + $0x100] sm:$0x3]  ;;  %v2783_v37 = vld [vmem:[%s2574_s27 + $0xf0] sm:$0xff]  ;;  %v318_v43 = vrot.slane %v2777_v34, 1  ;;  %v2805_v59 = vld [vmem:[%s2574_s27 + $0x108] sm:$0xff] }
  0x2c   : > { %4228 = vst [vmem:[#allocation16_spill] sm:$0xff] %v2773_v27  ;;  %v2790_v42 = vsel %vm266_vm0, %v313_v21, %v315_v26  ;;  %v320_v45 = vrot.slane %v2780_v35, 1  ;;  %v2795_v50 = vsel %vm266_vm0, %v312_v29, %v313_v21  ;;  %v317_v51 = vrot.slane %v2783_v37, 1  ;;  %v2799_v53 = vld [vmem:[%s2574_s27 + $0x110] sm:$0xff]  ;;  %v2802_v58 = vld [vmem:[%s2574_s27 + $0x118] sm:$0x3] }
  0x2d   : > { %361 = vrot.lane.b32.xlu1 %v2658_v33, %s2490_s28  ;;  %4229 = vst [vmem:[#allocation17_spill] sm:$0xff] %v2790_v42  ;;  %4230 = vst [vmem:[#allocation18_spill] sm:$0xff] %v2795_v50  ;;  %v323_v6 = vrot.slane %v2799_v53, 1  ;;  %v325_v8 = vrot.slane %v2802_v58, 1  ;;  %v322_v21 = vrot.slane %v2805_v59, 1  ;;  %v2821_v26 = vld [vmem:[%s2574_s27 + $0x128] sm:$0xff] }
  0x2e   : > { %359 = vrot.lane.b32.xlu0 %v2663_v36, %s2490_s28  ;;  %v2812_v61 = vsel %vm266_vm0, %v318_v43, %v320_v45  ;;  %v2817_v13 = vsel %vm266_vm0, %v317_v51, %v318_v43  ;;  %v2824_v29 = vld [vmem:[%s2574_s27 + $0x130] sm:$0x3]  ;;  %v328_v43 = vrot.slane %v2821_v26, 1 }
  0x2f   : > { %4231 = vst [vmem:[#allocation19_spill] sm:$0xff] %v2812_v61  ;;  %4232 = vst [vmem:[#allocation20_spill] sm:$0xff] %v2817_v13  ;;  %v2834_v45 = vsel %vm266_vm0, %v323_v6, %v325_v8  ;;  %v330_v51 = vrot.slane %v2824_v29, 1 }
  0x30   : > { %4233 = vst [vmem:[#allocation21_spill] sm:$0xff] %v2834_v45 }
  0x31   : > { %365 = vrot.lane.b32.xlu1 %v2680_v41, %s2490_s28  ;;  %v2856_v8 = vsel %vm266_vm0, %v328_v43, %v330_v51  ;;  %v2890_v41 = vld [vmem:[%s2574_s27 + $0x178] sm:$0x3] }
  0x32   : > { %363 = vrot.lane.b32.xlu0 %v2685_v44, %s2490_s28  ;;  %4235 = vst [vmem:[#allocation23_spill] sm:$0xff] %v2856_v8 }
  0x35   : > { %369 = vrot.lane.b32.xlu1 %v2702_v49, %s2490_s28 }
  0x36   : > { %367 = vrot.lane.b32.xlu0 %v2707_v52, %s2490_s28  ;;  %v2887_v52 = vld [vmem:[%s2574_s27 + $0x170] sm:$0xff] }
  0x39   : > { %373 = vrot.lane.b32.xlu1 %v2724_v57, %s2490_s28  ;;  %v2865_v57 = vld [vmem:[%s2574_s27 + $0x158] sm:$0xff] }
  0x3a   : > { %371 = vrot.lane.b32.xlu0 %v2729_v60, %s2490_s28 }
  0x3d   : > { %377 = vrot.lane.b32.xlu1 %v2746_v4, %s2490_s28 }
  0x3e   : > { %375 = vrot.lane.b32.xlu0 %v2751_v9, %s2490_s28 }
  0x41   : > { %381 = vrot.lane.b32.xlu1 %v2768_v20, %s2490_s28 }
  0x42   : > { %379 = vrot.lane.b32.xlu0 %v2773_v27, %s2490_s28  ;;  %v2843_v27 = vld [vmem:[%s2574_s27 + $0x140] sm:$0xff] }
  0x45   : > { %385 = vrot.lane.b32.xlu1 %v2790_v42, %s2490_s28  ;;  %v2827_v42 = vld [vmem:[%s2574_s27 + $0x120] sm:$0xff] }
  0x46   : > { %383 = vrot.lane.b32.xlu0 %v2795_v50, %s2490_s28  ;;  %v2839_v50 = vsel %vm266_vm0, %v322_v21, %v323_v6  ;;  %v327_v20 = vrot.slane %v2827_v42, 1  ;;  %v333_v6 = vrot.slane %v2843_v27, 1 }
  0x47   : > { %4234 = vst [vmem:[#allocation22_spill] sm:$0xff] %v2839_v50 }
  0x48   : > { %v2861_v4 = vsel %vm266_vm0, %v327_v20, %v328_v43  ;;  %v338_v20 = vrot.slane %v2865_v57, 1 }
  0x49   : > { %389 = vrot.lane.b32.xlu1 %v2812_v61, %s2490_s28  ;;  %v2846_v61 = vld [vmem:[%s2574_s27 + $0x148] sm:$0x3]  ;;  %4236 = vst [vmem:[#allocation24_spill] sm:$0xff] %v2861_v4 }
  0x4a   : > { %387 = vrot.lane.b32.xlu0 %v2817_v13, %s2490_s28  ;;  %v2849_v13 = vld [vmem:[%s2574_s27 + $0x138] sm:$0xff]  ;;  %v335_v21 = vrot.slane %v2846_v61, 1 }
  0x4b   : > { %v332_v9 = vrot.slane %v2849_v13, 1 }
  0x4c   : > { %v2878_v51 = vsel %vm266_vm0, %v333_v6, %v335_v21 }
  0x4d   : > { %393 = vrot.lane.b32.xlu1 %v2834_v45, %s2490_s28  ;;  %v2868_v45 = vld [vmem:[%s2574_s27 + $0x160] sm:$0x3]  ;;  %4237 = vst [vmem:[#allocation25_spill] sm:$0xff] %v2878_v51  ;;  %v2883_v60 = vsel %vm266_vm0, %v332_v9, %v333_v6  ;;  %v343_v9 = vrot.slane %v2887_v52, 1  ;;  %v345_v6 = vrot.slane %v2890_v41, 1 }
  0x4e   : > { %391 = vrot.lane.b32.xlu0 %v2839_v50, %s2490_s28  ;;  %v2871_v50 = vld [vmem:[%s2574_s27 + $0x150] sm:$0xff]  ;;  %v340_v43 = vrot.slane %v2868_v45, 1  ;;  %4238 = vst [vmem:[#allocation26_spill] sm:$0xff] %v2883_v60 }
  0x4f   : > { %v337_v49 = vrot.slane %v2871_v50, 1 }
  0x50   : > { %v2900_v21 = vsel %vm266_vm0, %v338_v20, %v340_v43  ;;  %v445_v43 = vrot.slane %v2588_v5, 2  ;;  %v452_v5 = vrot.slane %v2592_v7, 2  ;;  %v454_v7 = vrot.slane %v2610_v15, 2 }
  0x51   : > { %397 = vrot.lane.b32.xlu1 %v2856_v8, %s2490_s28  ;;  %v2893_v8 = vld [vmem:[%s2574_s27 + $0x168] sm:$0xff]  ;;  %4239 = vst [vmem:[#allocation27_spill] sm:$0xff] %v2900_v21 }
  0x52   : > { %395 = vrot.lane.b32.xlu0 %v2861_v4, %s2490_s28  ;;  %v2905_v4 = vsel %vm266_vm0, %v337_v49, %v338_v20  ;;  %v342_v44 = vrot.slane %v2893_v8, 1  ;;  %v444_v49 = vrot.slane %v2583_v2, 2  ;;  %v487_v2 = vrot.slane %v2736_v63, 2 }
  0x53   : > { %4240 = vst [vmem:[#allocation28_spill] sm:$0xff] %v2905_v4 }
  0x54   : > { %v2918_v33 = vsel %vm266_vm0, %v342_v44, %v343_v9  ;;  %v449_v44 = vrot.slane %v2577_v0, 2 }
  0x55   : > { %401 = vrot.lane.b32.xlu1 %v2878_v51, %s2490_s28  ;;  %v2913_v51 = vsel %vm266_vm0, %v343_v9, %v345_v6  ;;  %4242 = vst [vmem:[#allocation30_spill] sm:$0xff] %v2918_v33  ;;  %v450_v6 = vrot.slane %v2580_v1, 2 }
  0x56   : > { %399 = vrot.lane.b32.xlu0 %v2883_v60, %s2490_s28  ;;  %4241 = vst [vmem:[#allocation29_spill] sm:$0xff] %v2913_v51  ;;  %v447_v60 = vrot.slane %v2597_v10, 2  ;;  %v446_v10 = vsel %vm443_vm1, %v444_v49, %v445_v43  ;;  %v460_v49 = vrot.slane %v2624_v22, 2 }
  0x57   : > { %v2933_v9 = vsel %vm443_vm1, %v450_v6, %v452_v5 }
  0x58   : > { %v448_v20 = vsel %vm443_vm1, %v445_v43, %v447_v60  ;;  %v457_v60 = vrot.slane %v2607_v14, 2 }
  0x59   : > { %405 = vrot.lane.b32.xlu1 %v2900_v21, %s2490_s28  ;;  %v477_v21 = vrot.slane %v2692_v47, 2 }
  0x5a   : > { %403 = vrot.lane.b32.xlu0 %v2905_v4, %s2490_s28  ;;  %v482_v4 = vrot.slane %v2714_v55, 2 }
  0x5d   : > { %409 = vrot.lane.b32.xlu1 %v2913_v51, %s2490_s28  ;;  %v455_v51 = vrot.slane %v2600_v11, 2 }
  0x5e   : > { %407 = vrot.lane.b32.xlu0 %v2918_v33, %s2490_s28  ;;  %v2938_v33 = vsel %vm443_vm1, %v449_v44, %v450_v6  ;;  %v459_v6 = vrot.slane %v2630_v24, 2  ;;  %v467_v44 = vrot.slane %v2648_v31, 2  ;;  %s2497_s28 = smov 32  }
  0x5f   : > { %v2946_v43 = vsel %vm443_vm1, %v455_v51, %v457_v60  ;;  %v2951_v14 = vsel %vm443_vm1, %v454_v7, %v455_v51  ;;  %v464_v51 = vrot.slane %v2651_v32, 2  ;;  %v470_v7 = vrot.slane %v2667_v38, 2 }
  0x61   : > { %526 = vrot.lane.b32.xlu1 %v448_v20, %s2491_s29  ;;  %v462_v20 = vrot.slane %v2627_v23, 2  ;;  %v2964_v23 = vsel %vm443_vm1, %v459_v6, %v460_v49 }
  0x62   : > { %524 = vrot.lane.b32.xlu0 %v446_v10, %s2491_s29  ;;  %v465_v10 = vrot.slane %v2645_v30, 2 }
  0x63   : > { %v2959_v5 = vsel %vm443_vm1, %v460_v49, %v462_v20  ;;  %v472_v20 = vrot.slane %v2670_v39, 2  ;;  %v469_v49 = vrot.slane %v2673_v40, 2 }
  0x64   : > { %v2972_v60 = vsel %vm443_vm1, %v465_v10, %v467_v44  ;;  %v2977_v31 = vsel %vm443_vm1, %v464_v51, %v465_v10  ;;  %v475_v44 = vrot.slane %v2689_v46, 2  ;;  %v474_v10 = vrot.slane %v2695_v48, 2 }
  0x65   : > { %530 = vrot.lane.b32.xlu1 %v2933_v9, %s2491_s29  ;;  %v2985_v6 = vsel %vm443_vm1, %v470_v7, %v472_v20  ;;  %v2990_v39 = vsel %vm443_vm1, %v469_v49, %v470_v7  ;;  %v480_v20 = vrot.slane %v2711_v54, 2  ;;  %v479_v7 = vrot.slane %v2717_v56, 2 }
  0x66   : > { %528 = vrot.lane.b32.xlu0 %v2938_v33, %s2491_s29  ;;  %4243 = vst [vmem:[#allocation31_spill] sm:$0xff] %v2985_v6  ;;  %v2998_v51 = vsel %vm443_vm1, %v475_v44, %v477_v21  ;;  %v3003_v47 = vsel %vm443_vm1, %v474_v10, %v475_v44  ;;  %v485_v21 = vrot.slane %v2733_v62, 2  ;;  %v484_v44 = vrot.slane %v2739_v3, 2 }
  0x67   : > { %4244 = vst [vmem:[#allocation32_spill] sm:$0xff] %v2998_v51  ;;  %4245 = vst [vmem:[#allocation33_spill] sm:$0xff] %v3003_v47  ;;  %v3011_v49 = vsel %vm443_vm1, %v480_v20, %v482_v4  ;;  %v3016_v55 = vsel %vm443_vm1, %v479_v7, %v480_v20  ;;  %v490_v4 = vrot.slane %v2755_v16, 2  ;;  %v489_v20 = vrot.slane %v2761_v19, 2 }
  0x68   : > { %4246 = vst [vmem:[#allocation34_spill] sm:$0xff] %v3011_v49  ;;  %4247 = vst [vmem:[#allocation35_spill] sm:$0xff] %v3016_v55  ;;  %v3024_v10 = vsel %vm443_vm1, %v485_v21, %v487_v2  ;;  %v3029_v63 = vsel %vm443_vm1, %v484_v44, %v485_v21  ;;  %v495_v2 = vrot.slane %v2777_v34, 2  ;;  %v494_v21 = vrot.slane %v2783_v37, 2 }
  0x69   : > { %534 = vrot.lane.b32.xlu1 %v2946_v43, %s2491_s29  ;;  %4248 = vst [vmem:[#allocation36_spill] sm:$0xff] %v3024_v10  ;;  %4249 = vst [vmem:[#allocation37_spill] sm:$0xff] %v3029_v63 }
  0x6a   : > { %532 = vrot.lane.b32.xlu0 %v2951_v14, %s2491_s29 }
  0x6d   : > { %538 = vrot.lane.b32.xlu1 %v2959_v5, %s2491_s29 }
  0x6e   : > { %536 = vrot.lane.b32.xlu0 %v2964_v23, %s2491_s29 }
  0x71   : > { %542 = vrot.lane.b32.xlu1 %v2972_v60, %s2491_s29 }
  0x72   : > { %540 = vrot.lane.b32.xlu0 %v2977_v31, %s2491_s29 }
  0x75   : > { %546 = vrot.lane.b32.xlu1 %v2985_v6, %s2491_s29 }
  0x76   : > { %544 = vrot.lane.b32.xlu0 %v2990_v39, %s2491_s29 }
  0x79   : > { %550 = vrot.lane.b32.xlu1 %v2998_v51, %s2491_s29  ;;  %v492_v51 = vrot.slane %v2758_v18, 2  ;;  %v3042_v18 = vsel %vm443_vm1, %v489_v20, %v490_v4 }
  0x7a   : > { %548 = vrot.lane.b32.xlu0 %v3003_v47, %s2491_s29  ;;  %4251 = vst [vmem:[#allocation39_spill] sm:$0xff] %v3042_v18 }
  0x7b   : > { %v3037_v7 = vsel %vm443_vm1, %v490_v4, %v492_v51  ;;  %v500_v51 = vrot.slane %v2799_v53, 2  ;;  %v499_v4 = vrot.slane %v2805_v59, 2 }
  0x7c   : > { %4250 = vst [vmem:[#allocation38_spill] sm:$0xff] %v3037_v7 }
  0x7d   : > { %554 = vrot.lane.b32.xlu1 %v3011_v49, %s2491_s29  ;;  %v497_v49 = vrot.slane %v2780_v35, 2  ;;  %v3055_v35 = vsel %vm443_vm1, %v494_v21, %v495_v2 }
  0x7e   : > { %552 = vrot.lane.b32.xlu0 %v3016_v55, %s2491_s29  ;;  %4253 = vst [vmem:[#allocation41_spill] sm:$0xff] %v3055_v35 }
  0x7f   : > { %v3050_v44 = vsel %vm443_vm1, %v495_v2, %v497_v49  ;;  %v505_v49 = vrot.slane %v2821_v26, 2  ;;  %v504_v2 = vrot.slane %v2827_v42, 2 }
  0x80   : > { %4252 = vst [vmem:[#allocation40_spill] sm:$0xff] %v3050_v44 }
  0x81   : > { %558 = vrot.lane.b32.xlu1 %v3024_v10, %s2491_s29  ;;  %v502_v10 = vrot.slane %v2802_v58, 2  ;;  %v3068_v58 = vsel %vm443_vm1, %v499_v4, %v500_v51 }
  0x82   : > { %556 = vrot.lane.b32.xlu0 %v3029_v63, %s2491_s29  ;;  %4255 = vst [vmem:[#allocation43_spill] sm:$0xff] %v3068_v58  ;;  %v1487_v63 = vld [vmem:[%s4120_s1 + $0x8] sm:$0xff] }
  0x83   : > { %v3063_v20 = vsel %vm443_vm1, %v500_v51, %v502_v10  ;;  %v510_v10 = vrot.slane %v2843_v27, 2  ;;  %v509_v51 = vrot.slane %v2849_v13, 2 }
  0x84   : > { %4254 = vst [vmem:[#allocation42_spill] sm:$0xff] %v3063_v20 }
  0x85   : > { %562 = vrot.lane.b32.xlu1 %v3037_v7, %s2491_s29  ;;  %v507_v7 = vrot.slane %v2824_v29, 2  ;;  %v3081_v29 = vsel %vm443_vm1, %v504_v2, %v505_v49 }
  0x86   : > { %560 = vrot.lane.b32.xlu0 %v3042_v18, %s2491_s29  ;;  %4257 = vst [vmem:[#allocation45_spill] sm:$0xff] %v3081_v29 }
  0x87   : > { %v3076_v21 = vsel %vm443_vm1, %v505_v49, %v507_v7  ;;  %v515_v7 = vrot.slane %v2865_v57, 2  ;;  %v514_v49 = vrot.slane %v2871_v50, 2 }
  0x88   : > { %4256 = vst [vmem:[#allocation44_spill] sm:$0xff] %v3076_v21 }
  0x89   : > { %566 = vrot.lane.b32.xlu1 %v3050_v44, %s2491_s29  ;;  %v512_v44 = vrot.slane %v2846_v61, 2  ;;  %v3096_v61 = vsel %vm443_vm1, %v509_v51, %v510_v10  ;;  %v519_v51 = vrot.slane %v2893_v8, 2 }
  0x8a   : > { %564 = vrot.lane.b32.xlu0 %v3055_v35, %s2491_s29  ;;  %4260 = vst [vmem:[#allocation48_spill] sm:$0xff] %v3096_v61 }
  0x8b   : > { %v3089_v4 = vsel %vm443_vm1, %v510_v10, %v512_v44  ;;  %v3113_v10 = vsel %vm443_vm1, %v514_v49, %v515_v7 }
  0x8c   : > { %4258 = vst [vmem:[#allocation46_spill] sm:$0xff] %v3089_v4  ;;  %4264 = vst [vmem:[#allocation52_spill] sm:$0xff] %v3113_v10 }
  0x8d   : > { %570 = vrot.lane.b32.xlu1 %v3063_v20, %s2491_s29  ;;  %v517_v20 = vrot.slane %v2868_v45, 2  ;;  %v520_v45 = vrot.slane %v2887_v52, 2 }
  0x8e   : > { %568 = vrot.lane.b32.xlu0 %v3068_v58, %s2491_s29 }
  0x8f   : > { %v3106_v44 = vsel %vm443_vm1, %v515_v7, %v517_v20 }
  0x90   : > { %4262 = vst [vmem:[#allocation50_spill] sm:$0xff] %v3106_v44 }
  0x91   : > { %574 = vrot.lane.b32.xlu1 %v3076_v21, %s2491_s29  ;;  %v522_v21 = vrot.slane %v2890_v41, 2  ;;  %v3128_v41 = vsel %vm443_vm1, %v519_v51, %v520_v45 }
  0x92   : > { %572 = vrot.lane.b32.xlu0 %v3081_v29, %s2491_s29  ;;  %4268 = vst [vmem:[#allocation56_spill] sm:$0xff] %v3128_v41 }
  0x93   : > { %v3093_v58 = vpop.permute.xlu1 %351  ;;  %v3123_v20 = vsel %vm443_vm1, %v520_v45, %v522_v21 }
  0x94   : > { %4259 = vst [vmem:[#allocation47_spill] sm:$0xff] %v3093_v58  ;;  %v3099_v2 = vpop.permute.xlu0 %347  ;;  %4266 = vst [vmem:[#allocation54_spill] sm:$0xff] %v3123_v20  ;;  %v1486_v58 = vld [vmem:[%s4120_s1] sm:$0xff] }
  0x95   : > { %4261 = vst [vmem:[#allocation49_spill] sm:$0xff] %v3099_v2  ;;  %578 = vrot.lane.b32.xlu1 %v3089_v4, %s2491_s29 }
  0x96   : > { %576 = vrot.lane.b32.xlu0 %v3096_v61, %s2491_s29 }
  0x97   : > { %v3110_v29 = vpop.permute.xlu1 %353 }
  0x98   : > { %4263 = vst [vmem:[#allocation51_spill] sm:$0xff] %v3110_v29  ;;  %v3116_v35 = vpop.permute.xlu0 %349 }
  0x99   : > { %4265 = vst [vmem:[#allocation53_spill] sm:$0xff] %v3116_v35  ;;  %582 = vrot.lane.b32.xlu1 %v3106_v44, %s2491_s29  ;;  %v2314_v35 = vpack.c.bf16 %v1487_v63, %v1486_v58 }
  0x9a   : > { %580 = vrot.lane.b32.xlu0 %v3113_v10, %s2491_s29 }
  0x9b   : > { %v3125_v4 = vpop.permute.xlu1 %357  ;;  %2315 = vmatprep.subr.bf16.mxu0 %v2314_v35  ;;  %2322 = vmatprep.subr.bf16.mxu1 %v2314_v35 }
  0x9c   : > { %4267 = vst [vmem:[#allocation55_spill] sm:$0xff] %v3125_v4  ;;  %v3130_v7 = vpop.permute.xlu0 %355  ;;  %2317 = vmatpush3.bf16.msra.mxu0 %v2314_v35  ;;  %2325 = vmatpush3.bf16.msra.mxu1 %v2314_v35 }
  0x9d   : > { %4269 = vst [vmem:[#allocation57_spill] sm:$0xff] %v3130_v7  ;;  %586 = vrot.lane.b32.xlu1 %v3123_v20, %s2491_s29 }
  0x9e   : > { %584 = vrot.lane.b32.xlu0 %v3128_v41, %s2491_s29 }
  0x9f   : > { %v3136_v49 = vpop.permute.xlu1 %361 }
  0xa0   : > { %v3138_v44 = vpop.permute.xlu0 %359 }
  0xa1   : > { %4270 = vst [vmem:[#allocation58_spill] sm:$0xff] %v3138_v44  ;;  %624 = vrot.lane.b32.xlu1 %v2580_v1, %s2492_s30 }
  0xa2   : > { %622 = vrot.lane.b32.xlu0 %v2577_v0, %s2492_s30 }
  0xa3   : > { %v3144_v21 = vpop.permute.xlu1 %365 }
  0xa4   : > { %v3146_v45 = vpop.permute.xlu0 %363 }
  0xa5   : > { %628 = vrot.lane.b32.xlu1 %v2600_v11, %s2492_s30 }
  0xa6   : > { %626 = vrot.lane.b32.xlu0 %v2610_v15, %s2492_s30 }
  0xa7   : > { %v3152_v51 = vpop.permute.xlu1 %369 }
  0xa8   : > { %v3154_v20 = vpop.permute.xlu0 %367 }
  0xa9   : > { %632 = vrot.lane.b32.xlu1 %v2624_v22, %s2492_s30 }
  0xaa   : > { %630 = vrot.lane.b32.xlu0 %v2630_v24, %s2492_s30 }
  0xab   : > { %v3160_v0 = vpop.permute.xlu1 %373 }
  0xac   : > { %v3162_v1 = vpop.permute.xlu0 %371 }
  0xad   : > { %636 = vrot.lane.b32.xlu1 %v2645_v30, %s2492_s30 }
  0xae   : > { %634 = vrot.lane.b32.xlu0 %v2651_v32, %s2492_s30 }
  0xaf   : > { %v3168_v41 = vpop.permute.xlu1 %377 }
  0xb0   : > { %v3170_v10 = vpop.permute.xlu0 %375 }
  0xb1   : > { %640 = vrot.lane.b32.xlu1 %v2667_v38, %s2492_s30 }
  0xb2   : > { %638 = vrot.lane.b32.xlu0 %v2673_v40, %s2492_s30 }
  0xb3   : > { %v3176_v61 = vpop.permute.xlu1 %381 }
  0xb4   : > { %v3178_v44 = vpop.permute.xlu0 %379 }
  0xb5   : > { %644 = vrot.lane.b32.xlu1 %v2689_v46, %s2492_s30 }
  0xb6   : > { %642 = vrot.lane.b32.xlu0 %v2695_v48, %s2492_s30 }
  0xb7   : > { %v3184_v4 = vpop.permute.xlu1 %385 }
  0xb8   : > { %v3186_v18 = vpop.permute.xlu0 %383 }
  0xb9   : > { %648 = vrot.lane.b32.xlu1 %v2711_v54, %s2492_s30 }
  0xba   : > { %646 = vrot.lane.b32.xlu0 %v2717_v56, %s2492_s30 }
  0xbb   : > { %v3192_v7 = vpop.permute.xlu1 %389 }
  0xbc   : > { %v3194_v29 = vpop.permute.xlu0 %387 }
  0xbd   : > { %726 = vrot.lane.b32.xlu1 %v2617_v17, %s2493_s3  ;;  %v1488_v17 = vld [vmem:[%s4120_s1 + $0x10] sm:$0xff] }
  0xbe   : > { %724 = vrot.lane.b32.xlu0 %v2603_v12, %s2493_s3  ;;  %v1489_v12 = vld [vmem:[%s4120_s1 + $0x18] sm:$0xff] }
  0xbf   : > { %v3206_v2 = vpop.permute.xlu1 %393  ;;  %v2318_v63 = vpack.c.bf16 %v1489_v12, %v1488_v17 }
  0xc0   : > { %v3208_v55 = vpop.permute.xlu0 %391 }
  0xc1   : > { %827 = vrot.lane.b32.xlu1 %v2933_v9, %s2494_s8  ;;  %2319 = vmatprep.subr.bf16.mxu0 %v2318_v63 }
  0xc2   : > { %825 = vrot.lane.b32.xlu0 %v2938_v33, %s2494_s8  ;;  %2323 = vmatprep.subr.bf16.mxu1 %v2318_v63  ;;  %v1490_v33 = vld [vmem:[%s4120_s1 + $0x20] sm:$0xf] }
  0xc3   : > { %v3220_v58 = vpop.permute.xlu1 %397  ;;  %2321 = vmatpush3.bf16.msra.mxu0 %v2318_v63  ;;  %2326 = vmatpush3.bf16.msra.mxu1 %v2318_v63 }
  0xc4   : > { %v3222_v47 = vpop.permute.xlu0 %395  ;;  %2264 = vmatprep.subr.msk.mxu0 %vm1588_vm2, %v1490_v33  ;;  %2324 = vmatprep.subr.msk.mxu1 %vm1588_vm2, %v1490_v33 }
  0xc5   : > { %925 = vrot.lane.b32.xlu1 %v2600_v11, %s2495_s23 }
  0xc6   : > { %923 = vrot.lane.b32.xlu0 %v2610_v15, %s2495_s23 }
  0xc7   : > { %v3231_v9 = vpop.permute.xlu1 %401  ;;  %2265 = vmatpush3.msk.msra.mxu0 %vm1588_vm2, %v1490_v33  ;;  %2327 = vmatpush3.msk.msra.mxu1 %vm1588_vm2, %v1490_v33 }
  0xc8   : > { %v3233_v35 = vpop.permute.xlu0 %399 }
  0xc9   : > { %728 = vrot.lane.b32.xlu1 %v2641_v28, %s2493_s3 }
  0xca   : > { %1025 = vrot.lane.b32.xlu0 %v2641_v28, %s2496_s26 }
  0xcb   : > { %v3239_v11 = vpop.permute.xlu1 %405 }
  0xcc   : > { %v3241_v15 = vpop.permute.xlu0 %403 }
  0xcd   : > { %1126 = vrot.lane.b32.xlu1 %v2951_v14, %s2497_s28 }
  0xce   : > { %1027 = vrot.lane.b32.xlu0 %v2636_v25, %s2496_s26 }
  0xcf   : > { %v3247_v17 = vpop.permute.xlu1 %409 }
  0xd0   : > { %v3249_v12 = vpop.permute.xlu0 %407 }
  0xd1   : > { %829 = vrot.lane.b32.xlu1 %v2951_v14, %s2494_s8 }
  0xd2   : > { %730 = vrot.lane.b32.xlu0 %v2636_v25, %s2493_s3 }
  0xd3   : > { %v3255_v28 = vpop.permute.xlu1 %526 }
  0xd4   : > { %v3257_v63 = vpop.permute.xlu0 %524 }
  0xd5   : > { %831 = vrot.lane.b32.xlu1 %v2946_v43, %s2494_s8 }
  0xd6   : > { %1128 = vrot.lane.b32.xlu0 %v2946_v43, %s2497_s28  ;;  %v1230_v43 = vsel %vm1222_vm3, %v2624_v22, %v3136_v49 }
  0xd7   : > { %v3263_v33 = vpop.permute.xlu1 %530 }
  0xd8   : > { %4271 = vst [vmem:[#allocation59_spill] sm:$0xff] %v3263_v33  ;;  %v3265_v6 = vpop.permute.xlu0 %528 }
  0xd9   : > { %4272 = vst [vmem:[#allocation60_spill] sm:$0xff] %v3265_v6  ;;  %929 = vrot.lane.b32.xlu1 %v2624_v22, %s2495_s23  ;;  %v1231_v22 = vsel %vm1222_vm3, %v2651_v32, %v3146_v45  ;;  %v1233_v45 = vsel %vm1222_vm3, %v2673_v40, %v3154_v20 }
  0xda   : > { %927 = vrot.lane.b32.xlu0 %v2630_v24, %s2495_s23 }
  0xdb   : > { %v3271_v25 = vpop.permute.xlu1 %534 }
  0xdc   : > { %4273 = vst [vmem:[#allocation61_spill] sm:$0xff] %v3271_v25  ;;  %v3273_v14 = vpop.permute.xlu0 %532  ;;  %v4276_v25 = vld [vmem:[#allocation6_spill] sm:$0xff] }
  0xdd   : > { %4274 = vst [vmem:[#allocation62_spill] sm:$0xff] %v3273_v14  ;;  %732 = vrot.lane.b32.xlu1 %v2663_v36, %s2493_s3 }
  0xde   : > { %1029 = vrot.lane.b32.xlu0 %v2663_v36, %s2496_s26  ;;  %v1232_v36 = vsel %vm1222_vm3, %v2645_v30, %v3144_v21  ;;  %v1234_v21 = vsel %vm1222_vm3, %v2667_v38, %v3152_v51 }
  0xdf   : > { %v539_v33 = vpop.permute.xlu1 %538 }
  0xe0   : > { %v3283_v6 = vsel %vm1255_vm4, %v1230_v43, %v539_v33  ;;  %v3285_v24 = vpop.permute.xlu0 %536 }
  0xe1   : > { %4275 = vst [vmem:[#allocation63_spill] sm:$0xff] %v3283_v6  ;;  %1130 = vrot.lane.b32.xlu1 %v2964_v23, %s2497_s28 }
  0xe2   : > { %1031 = vrot.lane.b32.xlu0 %v4276_v25, %s2496_s26 }
  0xe3   : > { %v543_v14 = vpop.permute.xlu1 %542 }
  0xe4   : > { %v3298_v49 = vsel %vm1255_vm4, %v1232_v36, %v543_v14  ;;  %v541_v33 = vpop.permute.xlu0 %540 }
  0xe5   : > { %v3301_v43 = vsel %vm1255_vm4, %v1231_v22, %v541_v33  ;;  %833 = vrot.lane.b32.xlu1 %v2964_v23, %s2494_s8  ;;  %v1236_v23 = vsel %vm1222_vm3, %v2689_v46, %v3160_v0 }
  0xe6   : > { %734 = vrot.lane.b32.xlu0 %v4276_v25, %s2493_s3 }
  0xe7   : > { %v547_v6 = vpop.permute.xlu1 %546 }
  0xe8   : > { %v3314_v14 = vsel %vm1255_vm4, %v1234_v21, %v547_v6  ;;  %v545_v36 = vpop.permute.xlu0 %544  ;;  %v1235_v6 = vsel %vm1222_vm3, %v2695_v48, %v3162_v1  ;;  %v1237_v1 = vsel %vm1222_vm3, %v2717_v56, %v3170_v10  ;;  %v1239_v10 = vsel %vm1222_vm3, %v2739_v3, %v3178_v44 }
  0xe9   : > { %v3317_v22 = vsel %vm1255_vm4, %v1233_v45, %v545_v36  ;;  %835 = vrot.lane.b32.xlu1 %v2959_v5, %s2494_s8  ;;  %v1241_v44 = vsel %vm1222_vm3, %v2761_v19, %v3186_v18  ;;  %v1243_v18 = vsel %vm1222_vm3, %v2783_v37, %v3194_v29  ;;  %v1245_v37 = vsel %vm1222_vm3, %v2805_v59, %v3208_v55 }
  0xea   : > { %1132 = vrot.lane.b32.xlu0 %v2959_v5, %s2497_s28  ;;  %v1238_v5 = vsel %vm1222_vm3, %v2711_v54, %v3168_v41  ;;  %v1247_v59 = vsel %vm1222_vm3, %v2827_v42, %v3222_v47  ;;  %v1249_v42 = vsel %vm1222_vm3, %v2849_v13, %v3233_v35  ;;  %v1251_v13 = vsel %vm1222_vm3, %v2871_v50, %v3241_v15 }
  0xeb   : > { %v551_v51 = vpop.permute.xlu1 %550  ;;  %v1253_v50 = vsel %vm1222_vm3, %v2893_v8, %v3249_v12  ;;  %v4282_v12 = vld [vmem:[#allocation12_spill] sm:$0xff] }
  0xec   : > { %v3330_v20 = vsel %vm1255_vm4, %v1236_v23, %v551_v51  ;;  %v549_v25 = vpop.permute.xlu0 %548 }
  0xed   : > { %v3333_v33 = vsel %vm1255_vm4, %v1235_v6, %v549_v25  ;;  %933 = vrot.lane.b32.xlu1 %v2645_v30, %s2495_s23  ;;  %v4277_v30 = vld [vmem:[#allocation8_spill] sm:$0xff]  ;;  %v4278_v25 = vld [vmem:[#allocation7_spill] sm:$0xff] }
  0xee   : > { %931 = vrot.lane.b32.xlu0 %v2651_v32, %s2495_s23  ;;  %v1240_v32 = vsel %vm1222_vm3, %v2733_v62, %v3176_v61  ;;  %v1242_v61 = vsel %vm1222_vm3, %v2755_v16, %v3184_v4  ;;  %v1244_v4 = vsel %vm1222_vm3, %v2777_v34, %v3192_v7  ;;  %v1246_v34 = vsel %vm1222_vm3, %v2799_v53, %v3206_v2 }
  0xef   : > { %v555_v0 = vpop.permute.xlu1 %554  ;;  %v1248_v53 = vsel %vm1222_vm3, %v2821_v26, %v3220_v58 }
  0xf0   : > { %v3346_v21 = vsel %vm1255_vm4, %v1238_v5, %v555_v0  ;;  %v553_v45 = vpop.permute.xlu0 %552 }
  0xf1   : > { %v3349_v36 = vsel %vm1255_vm4, %v1237_v1, %v553_v45  ;;  %736 = vrot.lane.b32.xlu1 %v4277_v30, %s2493_s3 }
  0xf2   : > { %1033 = vrot.lane.b32.xlu0 %v4277_v30, %s2496_s26 }
  0xf3   : > { %v559_v41 = vpop.permute.xlu1 %558 }
  0xf4   : > { %v3362_v23 = vsel %vm1255_vm4, %v1240_v32, %v559_v41  ;;  %v557_v51 = vpop.permute.xlu0 %556 }
  0xf5   : > { %v3365_v6 = vsel %vm1255_vm4, %v1239_v10, %v557_v51  ;;  %1134 = vrot.lane.b32.xlu1 %v2977_v31, %s2497_s28 }
  0xf6   : > { %1035 = vrot.lane.b32.xlu0 %v4278_v25, %s2496_s26 }
  0xf7   : > { %v563_v5 = vpop.permute.xlu1 %562 }
  0xf8   : > { %v3378_v0 = vsel %vm1255_vm4, %v1242_v61, %v563_v5  ;;  %v561_v1 = vpop.permute.xlu0 %560  ;;  %v4280_v5 = vld [vmem:[#allocation9_spill] sm:$0xff] }
  0xf9   : > { %v3381_v45 = vsel %vm1255_vm4, %v1241_v44, %v561_v1  ;;  %837 = vrot.lane.b32.xlu1 %v2977_v31, %s2494_s8 }
  0xfa   : > { %738 = vrot.lane.b32.xlu0 %v4278_v25, %s2493_s3 }
  0xfb   : > { %v567_v30 = vpop.permute.xlu1 %566 }
  0xfc   : > { %v3394_v32 = vsel %vm1255_vm4, %v1244_v4, %v567_v30  ;;  %v565_v41 = vpop.permute.xlu0 %564 }
  0xfd   : > { %v3397_v10 = vsel %vm1255_vm4, %v1243_v18, %v565_v41  ;;  %839 = vrot.lane.b32.xlu1 %v2972_v60, %s2494_s8 }
  0xfe   : > { %1136 = vrot.lane.b32.xlu0 %v2972_v60, %s2497_s28 }
  0xff   : > { %v571_v31 = vpop.permute.xlu1 %570 }
 0x100   : > { %v3410_v29 = vsel %vm1255_vm4, %v1246_v34, %v571_v31  ;;  %v569_v7 = vpop.permute.xlu0 %568  ;;  %v4283_v31 = vld [vmem:[#allocation33_spill] sm:$0xff] }
 0x101   : > { %v3413_v51 = vsel %vm1255_vm4, %v1245_v37, %v569_v7  ;;  %937 = vrot.lane.b32.xlu1 %v2667_v38, %s2495_s23  ;;  %v4279_v38 = vld [vmem:[#allocation10_spill] sm:$0xff] }
 0x102   : > { %935 = vrot.lane.b32.xlu0 %v2673_v40, %s2495_s23  ;;  %v1250_v40 = vsel %vm1222_vm3, %v2843_v27, %v3231_v9  ;;  %v1252_v27 = vsel %vm1222_vm3, %v2865_v57, %v3239_v11  ;;  %v1254_v57 = vsel %vm1222_vm3, %v2887_v52, %v3247_v17 }
 0x103   : > { %v575_v60 = vpop.permute.xlu1 %574 }
 0x104   : > { %v3426_v55 = vsel %vm1255_vm4, %v1248_v53, %v575_v60  ;;  %v573_v2 = vpop.permute.xlu0 %572  ;;  %v4285_v60 = vld [vmem:[#allocation32_spill] sm:$0xff] }
 0x105   : > { %v3429_v25 = vsel %vm1255_vm4, %v1247_v59, %v573_v2  ;;  %740 = vrot.lane.b32.xlu1 %v4279_v38, %s2493_s3 }
 0x106   : > { %1037 = vrot.lane.b32.xlu0 %v4279_v38, %s2496_s26 }
 0x107   : > { %v579_v26 = vpop.permute.xlu1 %578 }
 0x108   : > { %v3442_v47 = vsel %vm1255_vm4, %v1250_v40, %v579_v26  ;;  %v577_v58 = vpop.permute.xlu0 %576  ;;  %v4286_v26 = vld [vmem:[#allocation14_spill] sm:$0xff] }
 0x109   : > { %v3445_v61 = vsel %vm1255_vm4, %v1249_v42, %v577_v58  ;;  %1138 = vrot.lane.b32.xlu1 %v2990_v39, %s2497_s28 }
 0x10a   : > { %1039 = vrot.lane.b32.xlu0 %v4280_v5, %s2496_s26 }
 0x10b   : > { %v583_v9 = vpop.permute.xlu1 %582 }
 0x10c   : > { %v3458_v35 = vsel %vm1255_vm4, %v1252_v27, %v583_v9  ;;  %v581_v44 = vpop.permute.xlu0 %580 }
 0x10d   : > { %v3461_v1 = vsel %vm1255_vm4, %v1251_v13, %v581_v44  ;;  %841 = vrot.lane.b32.xlu1 %v2990_v39, %s2494_s8  ;;  %v4281_v39 = vld [vmem:[#allocation31_spill] sm:$0xff]  ;;  %v4289_v44 = vld [vmem:[#allocation49_spill] sm:$0xff] }
 0x10e   : > { %742 = vrot.lane.b32.xlu0 %v4280_v5, %s2493_s3  ;;  %v4287_v5 = vld [vmem:[#allocation35_spill] sm:$0xff] }
 0x10f   : > { %v587_v11 = vpop.permute.xlu1 %586 }
 0x110   : > { %v3474_v15 = vsel %vm1255_vm4, %v1254_v57, %v587_v11  ;;  %v585_v4 = vpop.permute.xlu0 %584  ;;  %v4290_v57 = vld [vmem:[#allocation5_spill] sm:$0xff] }
 0x111   : > { %v3477_v30 = vsel %vm1255_vm4, %v1253_v50, %v585_v4  ;;  %843 = vrot.lane.b32.xlu1 %v4281_v39, %s2494_s8  ;;  %v1223_v11 = vsel %vm1222_vm3, %v4290_v57, %v4289_v44  ;;  %v4291_v50 = vld [vmem:[#allocation34_spill] sm:$0xff]  ;;  %v4293_v44 = vld [vmem:[#allocation53_spill] sm:$0xff] }
 0x112   : > { %1140 = vrot.lane.b32.xlu0 %v4281_v39, %s2497_s28  ;;  %v1256_v4 = vsel %vm1255_vm4, %v1223_v11, %v3257_v63 }
 0x113   : > { %v3483_v18 = vpop.permute.xlu1 %624 }
 0x114   : > { %v623_v52 = vpop.permute.xlu0 %622 }
 0x115   : > { %941 = vrot.lane.b32.xlu1 %v2689_v46, %s2495_s23  ;;  %v4284_v46 = vld [vmem:[#allocation11_spill] sm:$0xff]  ;;  %v1289_v39 = vsel %vm1288_vm5, %v1256_v4, %v623_v52 }
 0x116   : > { %939 = vrot.lane.b32.xlu0 %v2695_v48, %s2495_s23 }
 0x117   : > { %v3489_v8 = vpop.permute.xlu1 %628 }
 0x118   : > { %v3491_v17 = vpop.permute.xlu0 %626 }
 0x119   : > { %744 = vrot.lane.b32.xlu1 %v4282_v12, %s2493_s3 }
 0x11a   : > { %1041 = vrot.lane.b32.xlu0 %v4282_v12, %s2496_s26 }
 0x11b   : > { %v3497_v41 = vpop.permute.xlu1 %632 }
 0x11c   : > { %v3499_v34 = vpop.permute.xlu0 %630 }
 0x11d   : > { %1142 = vrot.lane.b32.xlu1 %v4283_v31, %s2497_s28 }
 0x11e   : > { %1043 = vrot.lane.b32.xlu0 %v4284_v46, %s2496_s26 }
 0x11f   : > { %v3505_v48 = vpop.permute.xlu1 %636 }
 0x120   : > { %v3507_v37 = vpop.permute.xlu0 %634 }
 0x121   : > { %845 = vrot.lane.b32.xlu1 %v4283_v31, %s2494_s8 }
 0x122   : > { %746 = vrot.lane.b32.xlu0 %v4284_v46, %s2493_s3 }
 0x123   : > { %v3513_v7 = vpop.permute.xlu1 %640 }
 0x124   : > { %v3515_v53 = vpop.permute.xlu0 %638 }
 0x125   : > { %847 = vrot.lane.b32.xlu1 %v4285_v60, %s2494_s8 }
 0x126   : > { %1144 = vrot.lane.b32.xlu0 %v4285_v60, %s2497_s28 }
 0x127   : > { %v3521_v59 = vpop.permute.xlu1 %644 }
 0x128   : > { %v3523_v2 = vpop.permute.xlu0 %642 }
 0x129   : > { %945 = vrot.lane.b32.xlu1 %v2711_v54, %s2495_s23  ;;  %v4288_v54 = vld [vmem:[#allocation13_spill] sm:$0xff] }
 0x12a   : > { %943 = vrot.lane.b32.xlu0 %v2717_v56, %s2495_s23 }
 0x12b   : > { %v3529_v38 = vpop.permute.xlu1 %648 }
 0x12c   : > { %v3531_v40 = vpop.permute.xlu0 %646 }
 0x12d   : > { %748 = vrot.lane.b32.xlu1 %v4286_v26, %s2493_s3 }
 0x12e   : > { %1045 = vrot.lane.b32.xlu0 %v4286_v26, %s2496_s26 }
 0x12f   : > { %v727_v42 = vpop.permute.xlu1 %726 }
 0x130   : > { %v725_v58 = vpop.permute.xlu0 %724 }
 0x131   : > { %1146 = vrot.lane.b32.xlu1 %v4287_v5, %s2497_s28  ;;  %v1322_v31 = vsel %vm1321_vm6, %v1289_v39, %v725_v58 }
 0x132   : > { %1047 = vrot.lane.b32.xlu0 %v4288_v54, %s2496_s26 }
 0x133   : > { %v828_v27 = vpop.permute.xlu1 %827 }
 0x134   : > { %v826_v56 = vpop.permute.xlu0 %825 }
 0x135   : > { %849 = vrot.lane.b32.xlu1 %v4287_v5, %s2494_s8  ;;  %v1355_v60 = vsel %vm1354_vm7, %v1322_v31, %v826_v56  ;;  %v2392_v56 = vld [vmem:[%s2574_s27 + $0x8] sm:$0xff] }
 0x136   : > { %750 = vrot.lane.b32.xlu0 %v4288_v54, %s2493_s3  ;;  %v4292_v54 = vld [vmem:[#allocation16_spill] sm:$0xff]  ;;  %v1224_v57 = vsel %vm1222_vm3, %v2392_v56, %v4293_v44 }
 0x137   : > { %v926_v9 = vpop.permute.xlu1 %925 }
 0x138   : > { %v924_v13 = vpop.permute.xlu0 %923 }
 0x139   : > { %851 = vrot.lane.b32.xlu1 %v4291_v50, %s2494_s8  ;;  %v1388_v63 = vsel %vm1387_vm8, %v1355_v60, %v924_v13 }
 0x13a   : > { %1148 = vrot.lane.b32.xlu0 %v4291_v50, %s2497_s28 }
 0x13b   : > { %v729_v12 = vpop.permute.xlu1 %728 }
 0x13c   : > { %v1026_v46 = vpop.permute.xlu0 %1025 }
 0x13d   : > { %650 = vrot.lane.b32.xlu1 %v2739_v3, %s2492_s30  ;;  %v1421_v52 = vsel %vm1420_vm9, %v1388_v63, %v1026_v46  ;;  %v4294_v63 = vld [vmem:[#allocation37_spill] sm:$0xff] }
 0x13e   : > { %947 = vrot.lane.b32.xlu0 %v2739_v3, %s2495_s23  ;;  %v1257_v3 = vsel %vm1255_vm4, %v1224_v57, %v3255_v28 }
 0x13f   : > { %v1127_v26 = vpop.permute.xlu1 %1126  ;;  %v1290_v11 = vsel %vm1288_vm5, %v1257_v3, %v3483_v18 }
 0x140   : > { %v1028_v5 = vpop.permute.xlu0 %1027  ;;  %v1454_v58 = vsel %vm1453_vm10, %v1421_v52, %v1127_v26  ;;  %v1323_v4 = vsel %vm1321_vm6, %v1290_v11, %v727_v42  ;;  %v4295_v42 = vld [vmem:[#allocation15_spill] sm:$0xff]  ;;  %v4298_v11 = vld [vmem:[#allocation36_spill] sm:$0xff] }
 0x141   : > { %1049 = vrot.lane.b32.xlu1 %v4292_v54, %s2496_s26  ;;  %2266 = vmatprep.mubr.msk.f32.mxu0 %vm1491_vm11, %v1454_v58  ;;  %v1356_v39 = vsel %vm1354_vm7, %v1323_v4, %v828_v27  ;;  %v2393_v26 = vld [vmem:[%s2574_s27 + $0x18] sm:$0xff] }
 0x142   : > { %949 = vrot.lane.b32.xlu0 %v2733_v62, %s2495_s23  ;;  %v1389_v31 = vsel %vm1387_vm8, %v1356_v39, %v926_v9 }
 0x143   : > { %v830_v13 = vpop.permute.xlu1 %829  ;;  %v1422_v28 = vsel %vm1420_vm9, %v1389_v31, %v1028_v5  ;;  %v4297_v5 = vld [vmem:[#allocation60_spill] sm:$0xff] }
 0x144   : > { %v731_v50 = vpop.permute.xlu0 %730 }
 0x145   : > { %752 = vrot.lane.b32.xlu1 %v4292_v54, %s2493_s3 }
 0x146   : > { %652 = vrot.lane.b32.xlu0 %v2733_v62, %s2492_s30  ;;  %v4296_v62 = vld [vmem:[#allocation47_spill] sm:$0xff] }
 0x147   : > { %v832_v46 = vpop.permute.xlu1 %831  ;;  %v1225_v9 = vsel %vm1222_vm3, %v2393_v26, %v4296_v62 }
 0x148   : > { %v1129_v60 = vpop.permute.xlu0 %1128  ;;  %v1258_v58 = vsel %vm1255_vm4, %v1225_v9, %v4297_v5  ;;  %v4301_v9 = vld [vmem:[#allocation18_spill] sm:$0xff] }
 0x149   : > { %v1455_v18 = vsel %vm1453_vm10, %v1422_v28, %v1129_v60  ;;  %1150 = vrot.lane.b32.xlu1 %v4294_v63, %s2497_s28  ;;  %v1291_v54 = vsel %vm1288_vm5, %v1258_v58, %v3491_v17 }
 0x14a   : > { %1051 = vrot.lane.b32.xlu0 %v4295_v42, %s2496_s26  ;;  %2267 = vmatmul.mubr.msk.f32.vlgmr.msra.gmra.mrb[0].mxu0 %vm1491_vm11, %v1455_v18  ;;  %v1324_v44 = vsel %vm1321_vm6, %v1291_v54, %v729_v12  ;;  %v2394_v12 = vld [vmem:[%s2574_s27 + $0x20] sm:$0xff]  ;;  %v4300_v18 = vld [vmem:[#allocation59_spill] sm:$0xff] }
 0x14b   : > { %v930_v27 = vpop.permute.xlu1 %929  ;;  %v1357_v3 = vsel %vm1354_vm7, %v1324_v44, %v830_v13  ;;  %v4299_v13 = vld [vmem:[#allocation51_spill] sm:$0xff] }
 0x14c   : > { %v928_v52 = vpop.permute.xlu0 %927  ;;  %v1226_v60 = vsel %vm1222_vm3, %v2394_v12, %v4299_v13 }
 0x14d   : > { %853 = vrot.lane.b32.xlu1 %v4294_v63, %s2494_s8  ;;  %v1390_v4 = vsel %vm1387_vm8, %v1357_v3, %v928_v52  ;;  %v1259_v63 = vsel %vm1255_vm4, %v1226_v60, %v4300_v18  ;;  %v4302_v3 = vld [vmem:[#allocation57_spill] sm:$0xff] }
 0x14e   : > { %754 = vrot.lane.b32.xlu0 %v4295_v42, %s2493_s3  ;;  %v1292_v52 = vsel %vm1288_vm5, %v1259_v63, %v3489_v8 }
 0x14f   : > { %v733_v56 = vpop.permute.xlu1 %732  ;;  %v1325_v62 = vsel %vm1321_vm6, %v1292_v52, %v731_v50 }
 0x150   : > { %v1030_v57 = vpop.permute.xlu0 %1029  ;;  %v1358_v5 = vsel %vm1354_vm7, %v1325_v62, %v832_v46  ;;  %v4307_v62 = vld [vmem:[#allocation55_spill] sm:$0xff] }
 0x151   : > { %855 = vrot.lane.b32.xlu1 %v4298_v11, %s2494_s8  ;;  %v1423_v39 = vsel %vm1420_vm9, %v1390_v4, %v1030_v57  ;;  %v2395_v57 = vld [vmem:[%s2574_s27 + $0x30] sm:$0xff] }
 0x152   : > { %1152 = vrot.lane.b32.xlu0 %v4298_v11, %s2497_s28  ;;  %v4303_v11 = vld [vmem:[#allocation39_spill] sm:$0xff]  ;;  %v4304_v4 = vld [vmem:[#allocation62_spill] sm:$0xff] }
 0x153   : > { %v1131_v31 = vpop.permute.xlu1 %1130 }
 0x154   : > { %v1456_v28 = vsel %vm1453_vm10, %v1423_v39, %v1131_v31  ;;  %v1032_v17 = vpop.permute.xlu0 %1031  ;;  %v4305_v31 = vld [vmem:[#allocation17_spill] sm:$0xff] }
 0x155   : > { %654 = vrot.lane.b32.xlu1 %v2761_v19, %s2492_s30  ;;  %2269 = vmatprep.mubr.msk.f32.mxu0 %vm1491_vm11, %v1456_v28 }
 0x156   : > { %951 = vrot.lane.b32.xlu0 %v2761_v19, %s2495_s23  ;;  %v1391_v19 = vsel %vm1387_vm8, %v1358_v5, %v930_v27  ;;  %v1227_v27 = vsel %vm1222_vm3, %v2395_v57, %v4302_v3  ;;  %v4308_v5 = vld [vmem:[#allocation61_spill] sm:$0xff]  ;;  %v2397_v57 = vld [vmem:[%s2574_s27 + $0xf0] sm:$0xff] }
 0x157   : > { %v834_v42 = vpop.permute.xlu1 %833  ;;  %v1424_v54 = vsel %vm1420_vm9, %v1391_v19, %v1032_v17  ;;  %v1260_v39 = vsel %vm1255_vm4, %v1227_v27, %v4304_v4 }
 0x158   : > { %v735_v26 = vpop.permute.xlu0 %734 }
 0x159   : > { %1053 = vrot.lane.b32.xlu1 %v4301_v9, %s2496_s26 }
 0x15a   : > { %953 = vrot.lane.b32.xlu0 %v2755_v16, %s2495_s23 }
 0x15b   : > { %v836_v58 = vpop.permute.xlu1 %835 }
 0x15c   : > { %v1133_v44 = vpop.permute.xlu0 %1132 }
 0x15d   : > { %v1457_v8 = vsel %vm1453_vm10, %v1424_v54, %v1133_v44  ;;  %756 = vrot.lane.b32.xlu1 %v4301_v9, %s2493_s3 }
 0x15e   : > { %656 = vrot.lane.b32.xlu0 %v2755_v16, %s2492_s30  ;;  %2270 = vmatmul.mubr.msk.f32.gmra.mrb[2].mxu0 %vm1491_vm11, %v1457_v8  ;;  %v1293_v16 = vsel %vm1288_vm5, %v1260_v39, %v3499_v34 }
 0x15f   : > { %v934_v50 = vpop.permute.xlu1 %933  ;;  %v1326_v17 = vsel %vm1321_vm6, %v1293_v16, %v733_v56  ;;  %v4306_v56 = vld [vmem:[#allocation38_spill] sm:$0xff] }
 0x160   : > { %v932_v46 = vpop.permute.xlu0 %931  ;;  %v1359_v13 = vsel %vm1354_vm7, %v1326_v17, %v834_v42  ;;  %v2396_v42 = vld [vmem:[%s2574_s27 + $0x38] sm:$0xff]  ;;  %v2399_v17 = vld [vmem:[%s2574_s27 + $0x48] sm:$0xff] }
 0x161   : > { %1154 = vrot.lane.b32.xlu1 %v4303_v11, %s2497_s28  ;;  %v1392_v60 = vsel %vm1387_vm8, %v1359_v13, %v932_v46  ;;  %v1228_v9 = vsel %vm1222_vm3, %v2396_v42, %v4307_v62  ;;  %v4312_v62 = vld [vmem:[#allocation19_spill] sm:$0xff] }
 0x162   : > { %1055 = vrot.lane.b32.xlu0 %v4305_v31, %s2496_s26  ;;  %v1261_v19 = vsel %vm1255_vm4, %v1228_v9, %v4308_v5 }
 0x163   : > { %v737_v28 = vpop.permute.xlu1 %736  ;;  %v1294_v44 = vsel %vm1288_vm5, %v1261_v19, %v3497_v41  ;;  %v4309_v41 = vld [vmem:[#allocation20_spill] sm:$0xff]  ;;  %v4313_v19 = vld [vmem:[#allocation63_spill] sm:$0xff] }
 0x164   : > { %v1034_v12 = vpop.permute.xlu0 %1033  ;;  %v1327_v46 = vsel %vm1321_vm6, %v1294_v44, %v735_v26  ;;  %v2398_v26 = vld [vmem:[%s2574_s27 + $0xf8] sm:$0xff] }
 0x165   : > { %857 = vrot.lane.b32.xlu1 %v4303_v11, %s2494_s8  ;;  %v1425_v18 = vsel %vm1420_vm9, %v1392_v60, %v1034_v12  ;;  %v1360_v3 = vsel %vm1354_vm7, %v1327_v46, %v836_v58  ;;  %v4310_v12 = vld [vmem:[#allocation58_spill] sm:$0xff] }
 0x166   : > { %758 = vrot.lane.b32.xlu0 %v4305_v31, %s2493_s3  ;;  %v1393_v27 = vsel %vm1387_vm8, %v1360_v3, %v934_v50  ;;  %v1229_v50 = vsel %vm1222_vm3, %v2399_v17, %v4310_v12 }
 0x167   : > { %v1135_v63 = vpop.permute.xlu1 %1134  ;;  %v1262_v13 = vsel %vm1255_vm4, %v1229_v50, %v3285_v24 }
 0x168   : > { %v1458_v34 = vsel %vm1453_vm10, %v1425_v18, %v1135_v63  ;;  %v1036_v52 = vpop.permute.xlu0 %1035  ;;  %v1295_v60 = vsel %vm1288_vm5, %v1262_v13, %v3507_v37 }
 0x169   : > { %859 = vrot.lane.b32.xlu1 %v4306_v56, %s2494_s8  ;;  %2272 = vmatprep.mubr.msk.f32.mxu0 %vm1491_vm11, %v1458_v34  ;;  %v1426_v4 = vsel %vm1420_vm9, %v1393_v27, %v1036_v52  ;;  %v1328_v63 = vsel %vm1321_vm6, %v1295_v60, %v737_v28 }
 0x16a   : > { %1156 = vrot.lane.b32.xlu0 %v4306_v56, %s2497_s28  ;;  %v4311_v56 = vld [vmem:[#allocation41_spill] sm:$0xff] }
 0x16b   : > { %v838_v54 = vpop.permute.xlu1 %837 }
 0x16c   : > { %v739_v8 = vpop.permute.xlu0 %738  ;;  %v1361_v52 = vsel %vm1354_vm7, %v1328_v63, %v838_v54  ;;  %v1296_v54 = vsel %vm1288_vm5, %v4313_v19, %v3505_v48 }
 0x16d   : > { %658 = vrot.lane.b32.xlu1 %v2397_v57, %s2492_s30  ;;  %v1329_v46 = vsel %vm1321_vm6, %v1296_v54, %v739_v8 }
 0x16e   : > { %955 = vrot.lane.b32.xlu0 %v2397_v57, %s2495_s23  ;;  %v4314_v57 = vld [vmem:[#allocation40_spill] sm:$0xff] }
 0x16f   : > { %v840_v11 = vpop.permute.xlu1 %839 }
 0x170   : > { %v1137_v39 = vpop.permute.xlu0 %1136  ;;  %v1362_v3 = vsel %vm1354_vm7, %v1329_v46, %v840_v11  ;;  %v2402_v46 = vld [vmem:[%s2574_s27 + $0x120] sm:$0xff] }
 0x171   : > { %v1459_v31 = vsel %vm1453_vm10, %v1426_v4, %v1137_v39  ;;  %1057 = vrot.lane.b32.xlu1 %v4309_v41, %s2496_s26 }
 0x172   : > { %957 = vrot.lane.b32.xlu0 %v2398_v26, %s2495_s23  ;;  %2273 = vmatmul.mubr.msk.f32.gmra.mrb[4].mxu0 %vm1491_vm11, %v1459_v31 }
 0x173   : > { %v938_v16 = vpop.permute.xlu1 %937 }
 0x174   : > { %v936_v58 = vpop.permute.xlu0 %935  ;;  %v1395_v27 = vsel %vm1387_vm8, %v1362_v3, %v938_v16  ;;  %v1297_v16 = vsel %vm1288_vm5, %v3301_v43, %v3515_v53  ;;  %v4316_v43 = vld [vmem:[#allocation43_spill] sm:$0xff]  ;;  %v4317_v53 = vld [vmem:[#allocation21_spill] sm:$0xff] }
 0x175   : > { %760 = vrot.lane.b32.xlu1 %v4309_v41, %s2493_s3  ;;  %v1394_v42 = vsel %vm1387_vm8, %v1361_v52, %v936_v58  ;;  %v2400_v41 = vld [vmem:[%s2574_s27 + $0x108] sm:$0xff]  ;;  %v2401_v58 = vld [vmem:[%s2574_s27 + $0x110] sm:$0xff] }
 0x176   : > { %660 = vrot.lane.b32.xlu0 %v2398_v26, %s2492_s30  ;;  %v4315_v26 = vld [vmem:[#allocation22_spill] sm:$0xff] }
 0x177   : > { %v741_v18 = vpop.permute.xlu1 %740 }
 0x178   : > { %v1038_v34 = vpop.permute.xlu0 %1037  ;;  %v1330_v12 = vsel %vm1321_vm6, %v1297_v16, %v741_v18 }
 0x179   : > { %1158 = vrot.lane.b32.xlu1 %v4311_v56, %s2497_s28  ;;  %v1427_v24 = vsel %vm1420_vm9, %v1394_v42, %v1038_v34  ;;  %v1298_v42 = vsel %vm1288_vm5, %v3298_v49, %v3513_v7  ;;  %v4318_v7 = vld [vmem:[#allocation42_spill] sm:$0xff] }
 0x17a   : > { %1059 = vrot.lane.b32.xlu0 %v4312_v62, %s2496_s26 }
 0x17b   : > { %v1139_v9 = vpop.permute.xlu1 %1138 }
 0x17c   : > { %v1460_v5 = vsel %vm1453_vm10, %v1427_v24, %v1139_v9  ;;  %v1040_v37 = vpop.permute.xlu0 %1039 }
 0x17d   : > { %861 = vrot.lane.b32.xlu1 %v4311_v56, %s2494_s8  ;;  %2275 = vmatprep.mubr.msk.f32.mxu0 %vm1491_vm11, %v1460_v5  ;;  %v1428_v39 = vsel %vm1420_vm9, %v1395_v27, %v1040_v37 }
 0x17e   : > { %762 = vrot.lane.b32.xlu0 %v4312_v62, %s2493_s3 }
 0x17f   : > { %v842_v28 = vpop.permute.xlu1 %841 }
 0x180   : > { %v743_v44 = vpop.permute.xlu0 %742  ;;  %v1363_v13 = vsel %vm1354_vm7, %v1330_v12, %v842_v28  ;;  %v4320_v12 = vld [vmem:[#allocation45_spill] sm:$0xff] }
 0x181   : > { %863 = vrot.lane.b32.xlu1 %v4314_v57, %s2494_s8  ;;  %v1331_v24 = vsel %vm1321_vm6, %v1298_v42, %v743_v44  ;;  %v2404_v42 = vld [vmem:[%s2574_s27 + $0x138] sm:$0xff] }
 0x182   : > { %1160 = vrot.lane.b32.xlu0 %v4314_v57, %s2497_s28  ;;  %v1299_v57 = vsel %vm1288_vm5, %v3317_v22, %v3523_v2 }
 0x183   : > { %v844_v4 = vpop.permute.xlu1 %843 }
 0x184   : > { %v1141_v31 = vpop.permute.xlu0 %1140  ;;  %v1364_v9 = vsel %vm1354_vm7, %v1331_v24, %v844_v4 }
 0x185   : > { %v1461_v48 = vsel %vm1453_vm10, %v1428_v39, %v1141_v31  ;;  %662 = vrot.lane.b32.xlu1 %v2400_v41, %s2492_s30  ;;  %v4319_v31 = vld [vmem:[#allocation24_spill] sm:$0xff] }
 0x186   : > { %959 = vrot.lane.b32.xlu0 %v2400_v41, %s2495_s23  ;;  %2276 = vmatmul.mubr.msk.f32.gmra.mrb[6].mxu0 %vm1491_vm11, %v1461_v48  ;;  %v2403_v41 = vld [vmem:[%s2574_s27 + $0x128] sm:$0xff] }
 0x187   : > { %v942_v8 = vpop.permute.xlu1 %941 }
 0x188   : > { %v940_v11 = vpop.permute.xlu0 %939  ;;  %v1397_v5 = vsel %vm1387_vm8, %v1364_v9, %v942_v8 }
 0x189   : > { %1061 = vrot.lane.b32.xlu1 %v4315_v26, %s2496_s26  ;;  %v1396_v60 = vsel %vm1387_vm8, %v1363_v13, %v940_v11  ;;  %v4321_v13 = vld [vmem:[#allocation23_spill] sm:$0xff] }
 0x18a   : > { %961 = vrot.lane.b32.xlu0 %v2401_v58, %s2495_s23 }
 0x18b   : > { %v745_v17 = vpop.permute.xlu1 %744 }
 0x18c   : > { %v1042_v50 = vpop.permute.xlu0 %1041  ;;  %v1332_v27 = vsel %vm1321_vm6, %v1299_v57, %v745_v17 }
 0x18d   : > { %764 = vrot.lane.b32.xlu1 %v4315_v26, %s2493_s3  ;;  %v1429_v63 = vsel %vm1420_vm9, %v1396_v60, %v1042_v50 }
 0x18e   : > { %664 = vrot.lane.b32.xlu0 %v2401_v58, %s2492_s30  ;;  %v1300_v58 = vsel %vm1288_vm5, %v3314_v14, %v3521_v59 }
 0x18f   : > { %v1143_v34 = vpop.permute.xlu1 %1142 }
 0x190   : > { %v1462_v52 = vsel %vm1453_vm10, %v1429_v63, %v1143_v34  ;;  %v1044_v56 = vpop.permute.xlu0 %1043 }
 0x191   : > { %1162 = vrot.lane.b32.xlu1 %v4316_v43, %s2497_s28  ;;  %2278 = vmatprep.mubr.msk.f32.mxu0 %vm1491_vm11, %v1462_v52  ;;  %v1430_v28 = vsel %vm1420_vm9, %v1397_v5, %v1044_v56 }
 0x192   : > { %1063 = vrot.lane.b32.xlu0 %v4317_v53, %s2496_s26 }
 0x193   : > { %v846_v18 = vpop.permute.xlu1 %845 }
 0x194   : > { %v747_v62 = vpop.permute.xlu0 %746  ;;  %v1365_v39 = vsel %vm1354_vm7, %v1332_v27, %v846_v18  ;;  %v4324_v27 = vld [vmem:[#allocation48_spill] sm:$0xff] }
 0x195   : > { %865 = vrot.lane.b32.xlu1 %v4316_v43, %s2494_s8  ;;  %v1333_v17 = vsel %vm1321_vm6, %v1300_v58, %v747_v62  ;;  %v4322_v43 = vld [vmem:[#allocation44_spill] sm:$0xff]  ;;  %v1301_v62 = vsel %vm1288_vm5, %v3333_v33, %v3531_v40  ;;  %v2406_v58 = vld [vmem:[%s2574_s27 + $0x150] sm:$0xff] }
 0x196   : > { %766 = vrot.lane.b32.xlu0 %v4317_v53, %s2493_s3 }
 0x197   : > { %v848_v37 = vpop.permute.xlu1 %847 }
 0x198   : > { %v1145_v19 = vpop.permute.xlu0 %1144  ;;  %v1366_v50 = vsel %vm1354_vm7, %v1333_v17, %v848_v37 }
 0x199   : > { %v1463_v49 = vsel %vm1453_vm10, %v1430_v28, %v1145_v19  ;;  %867 = vrot.lane.b32.xlu1 %v4318_v7, %s2494_s8  ;;  %v4323_v28 = vld [vmem:[#allocation26_spill] sm:$0xff] }
 0x19a   : > { %1164 = vrot.lane.b32.xlu0 %v4318_v7, %s2497_s28  ;;  %2279 = vmatmul.mubr.msk.f32.gmra.mrb[8].mxu0 %vm1491_vm11, %v1463_v49  ;;  %v2405_v49 = vld [vmem:[%s2574_s27 + $0x140] sm:$0xff] }
 0x19b   : > { %v946_v54 = vpop.permute.xlu1 %945 }
 0x19c   : > { %v944_v44 = vpop.permute.xlu0 %943  ;;  %v1399_v60 = vsel %vm1387_vm8, %v1366_v50, %v946_v54 }
 0x19d   : > { %666 = vrot.lane.b32.xlu1 %v2402_v46, %s2492_s30  ;;  %v1398_v48 = vsel %vm1387_vm8, %v1365_v39, %v944_v44  ;;  %v4325_v39 = vld [vmem:[#allocation25_spill] sm:$0xff] }
 0x19e   : > { %963 = vrot.lane.b32.xlu0 %v2402_v46, %s2495_s23  ;;  %v1302_v46 = vsel %vm1288_vm5, %v3330_v20, %v3529_v38 }
 0x19f   : > { %v749_v3 = vpop.permute.xlu1 %748 }
 0x1a0   : > { %v1046_v4 = vpop.permute.xlu0 %1045  ;;  %v1334_v9 = vsel %vm1321_vm6, %v1301_v62, %v749_v3 }
 0x1a1   : > { %1065 = vrot.lane.b32.xlu1 %v4319_v31, %s2496_s26  ;;  %v1431_v8 = vsel %vm1420_vm9, %v1398_v48, %v1046_v4 }
 0x1a2   : > { %965 = vrot.lane.b32.xlu0 %v2403_v41, %s2495_s23 }
 0x1a3   : > { %v1147_v11 = vpop.permute.xlu1 %1146 }
 0x1a4   : > { %v1464_v26 = vsel %vm1453_vm10, %v1431_v8, %v1147_v11  ;;  %v1048_v22 = vpop.permute.xlu0 %1047 }
 0x1a5   : > { %768 = vrot.lane.b32.xlu1 %v4319_v31, %s2493_s3  ;;  %2281 = vmatprep.mubr.msk.f32.mxu0 %vm1491_vm11, %v1464_v26  ;;  %v1432_v34 = vsel %vm1420_vm9, %v1399_v60, %v1048_v22  ;;  %v4326_v26 = vld [vmem:[#allocation46_spill] sm:$0xff]  ;;  %v4327_v60 = vld [vmem:[#allocation28_spill] sm:$0xff] }
 0x1a6   : > { %668 = vrot.lane.b32.xlu0 %v2403_v41, %s2492_s30 }
 0x1a7   : > { %v850_v2 = vpop.permute.xlu1 %849 }
 0x1a8   : > { %v751_v16 = vpop.permute.xlu0 %750  ;;  %v1367_v37 = vsel %vm1354_vm7, %v1334_v9, %v850_v2 }
 0x1a9   : > { %1166 = vrot.lane.b32.xlu1 %v4320_v12, %s2497_s28  ;;  %v1335_v3 = vsel %vm1321_vm6, %v1302_v46, %v751_v16 }
 0x1aa   : > { %1067 = vrot.lane.b32.xlu0 %v4321_v13, %s2496_s26 }
 0x1ab   : > { %v852_v63 = vpop.permute.xlu1 %851 }
 0x1ac   : > { %v1149_v52 = vpop.permute.xlu0 %1148  ;;  %v1368_v4 = vsel %vm1354_vm7, %v1335_v3, %v852_v63 }
 0x1ad   : > { %v1465_v14 = vsel %vm1453_vm10, %v1432_v34, %v1149_v52  ;;  %869 = vrot.lane.b32.xlu1 %v4320_v12, %s2494_s8  ;;  %v2407_v34 = vld [vmem:[%s2574_s27 + $0x158] sm:$0xff] }
 0x1ae   : > { %770 = vrot.lane.b32.xlu0 %v4321_v13, %s2493_s3  ;;  %2282 = vmatmul.mubr.msk.f32.gmra.mrb[10].mxu0 %vm1491_vm11, %v1465_v14 }
 0x1af   : > { %v651_v59 = vpop.permute.xlu1 %650 }
 0x1b0   : > { %v948_v56 = vpop.permute.xlu0 %947  ;;  %v1303_v16 = vsel %vm1288_vm5, %v3349_v36, %v651_v59 }
 0x1b1   : > { %871 = vrot.lane.b32.xlu1 %v4322_v43, %s2494_s8  ;;  %v1400_v19 = vsel %vm1387_vm8, %v1367_v37, %v948_v56 }
 0x1b2   : > { %1168 = vrot.lane.b32.xlu0 %v4322_v43, %s2497_s28 }
 0x1b3   : > { %v1050_v53 = vpop.permute.xlu1 %1049 }
 0x1b4   : > { %v950_v18 = vpop.permute.xlu0 %949  ;;  %v1433_v7 = vsel %vm1420_vm9, %v1400_v19, %v1050_v53 }
 0x1b5   : > { %670 = vrot.lane.b32.xlu1 %v2404_v42, %s2492_s30  ;;  %v1401_v31 = vsel %vm1387_vm8, %v1368_v4, %v950_v18  ;;  %v4331_v4 = vld [vmem:[#allocation30_spill] sm:$0xff] }
 0x1b6   : > { %967 = vrot.lane.b32.xlu0 %v2404_v42, %s2495_s23  ;;  %v4328_v42 = vld [vmem:[#allocation52_spill] sm:$0xff] }
 0x1b7   : > { %v753_v24 = vpop.permute.xlu1 %752 }
 0x1b8   : > { %v653_v5 = vpop.permute.xlu0 %652  ;;  %v1336_v12 = vsel %vm1321_vm6, %v1303_v16, %v753_v24  ;;  %v4329_v24 = vld [vmem:[#allocation27_spill] sm:$0xff] }
 0x1b9   : > { %1069 = vrot.lane.b32.xlu1 %v4323_v28, %s2496_s26  ;;  %v1304_v43 = vsel %vm1288_vm5, %v3346_v21, %v653_v5 }
 0x1ba   : > { %969 = vrot.lane.b32.xlu0 %v2405_v49, %s2495_s23 }
 0x1bb   : > { %v1151_v54 = vpop.permute.xlu1 %1150 }
 0x1bc   : > { %v1466_v44 = vsel %vm1453_vm10, %v1433_v7, %v1151_v54  ;;  %v1052_v33 = vpop.permute.xlu0 %1051  ;;  %v4330_v7 = vld [vmem:[#allocation50_spill] sm:$0xff] }
 0x1bd   : > { %772 = vrot.lane.b32.xlu1 %v4323_v28, %s2493_s3  ;;  %2284 = vmatprep.mubr.msk.f32.mxu0 %vm1491_vm11, %v1466_v44  ;;  %v1434_v41 = vsel %vm1420_vm9, %v1401_v31, %v1052_v33  ;;  %v2408_v33 = vld [vmem:[%s2574_s27 + $0x168] sm:$0xff]  ;;  %v2409_v31 = vld [vmem:[%s2574_s27 + $0x170] sm:$0xff] }
 0x1be   : > { %672 = vrot.lane.b32.xlu0 %v2405_v49, %s2492_s30 }
 0x1bf   : > { %v854_v40 = vpop.permute.xlu1 %853 }
 0x1c0   : > { %v755_v57 = vpop.permute.xlu0 %754  ;;  %v1369_v13 = vsel %vm1354_vm7, %v1336_v12, %v854_v40 }
 0x1c1   : > { %1170 = vrot.lane.b32.xlu1 %v4324_v27, %s2497_s28  ;;  %v1337_v18 = vsel %vm1321_vm6, %v1304_v43, %v755_v57 }
 0x1c2   : > { %1071 = vrot.lane.b32.xlu0 %v4325_v39, %s2496_s26 }
 0x1c3   : > { %v856_v48 = vpop.permute.xlu1 %855 }
 0x1c4   : > { %v1153_v8 = vpop.permute.xlu0 %1152  ;;  %v1370_v62 = vsel %vm1354_vm7, %v1337_v18, %v856_v48 }
 0x1c5   : > { %v1467_v20 = vsel %vm1453_vm10, %v1434_v41, %v1153_v8  ;;  %873 = vrot.lane.b32.xlu1 %v4324_v27, %s2494_s8 }
 0x1c6   : > { %774 = vrot.lane.b32.xlu0 %v4325_v39, %s2493_s3  ;;  %2285 = vmatmul.mubr.msk.f32.gmra.mrb[12].mxu0 %vm1491_vm11, %v1467_v20 }
 0x1c7   : > { %v655_v38 = vpop.permute.xlu1 %654 }
 0x1c8   : > { %v952_v11 = vpop.permute.xlu0 %951  ;;  %v1305_v40 = vsel %vm1288_vm5, %v3365_v6, %v655_v38 }
 0x1c9   : > { %875 = vrot.lane.b32.xlu1 %v4326_v26, %s2494_s8  ;;  %v1402_v63 = vsel %vm1387_vm8, %v1369_v13, %v952_v11 }
 0x1ca   : > { %1172 = vrot.lane.b32.xlu0 %v4326_v26, %s2497_s28 }
 0x1cb   : > { %v1054_v22 = vpop.permute.xlu1 %1053 }
 0x1cc   : > { %v954_v2 = vpop.permute.xlu0 %953  ;;  %v1435_v52 = vsel %vm1420_vm9, %v1402_v63, %v1054_v22  ;;  %v4332_v22 = vld [vmem:[#allocation56_spill] sm:$0xff]  ;;  %v213_v63 = vld [vmem:[%s2574_s27 + $0x188] sm:$0xff] }
 0x1cd   : > { %674 = vrot.lane.b32.xlu1 %v2406_v58, %s2492_s30  ;;  %v1403_v9 = vsel %vm1387_vm8, %v1370_v62, %v954_v2 }
 0x1ce   : > { %971 = vrot.lane.b32.xlu0 %v2406_v58, %s2495_s23  ;;  %v4333_v58 = vld [vmem:[#allocation29_spill] sm:$0xff] }
 0x1cf   : > { %v757_v17 = vpop.permute.xlu1 %756 }
 0x1d0   : > { %v657_v50 = vpop.permute.xlu0 %656  ;;  %v1338_v57 = vsel %vm1321_vm6, %v1305_v40, %v757_v17 }
 0x1d1   : > { %1073 = vrot.lane.b32.xlu1 %v4327_v60, %s2496_s26  ;;  %v1306_v38 = vsel %vm1288_vm5, %v3362_v23, %v657_v50 }
 0x1d2   : > { %973 = vrot.lane.b32.xlu0 %v2407_v34, %s2495_s23 }
 0x1d3   : > { %v1155_v14 = vpop.permute.xlu1 %1154 }
 0x1d4   : > { %v1468_v56 = vsel %vm1453_vm10, %v1435_v52, %v1155_v14  ;;  %v1056_v36 = vpop.permute.xlu0 %1055  ;;  %v4334_v52 = vld [vmem:[#allocation54_spill] sm:$0xff] }
 0x1d5   : > { %776 = vrot.lane.b32.xlu1 %v4327_v60, %s2493_s3  ;;  %2287 = vmatprep.mubr.msk.f32.mxu0 %vm1491_vm11, %v1468_v56  ;;  %v1436_v28 = vsel %vm1420_vm9, %v1403_v9, %v1056_v36  ;;  %v212_v60 = vld [vmem:[%s2574_s27 + $0x180] sm:$0xff]  ;;  %v720_v56 = vrot.slane %v213_v63, 1 }
 0x1d6   : > { %676 = vrot.lane.b32.xlu0 %v2407_v34, %s2492_s30  ;;  %v719_v14 = vrot.slane %v212_v60, 1 }
 0x1d7   : > { %v858_v59 = vpop.permute.xlu1 %857 }
 0x1d8   : > { %v759_v53 = vpop.permute.xlu0 %758  ;;  %v1371_v27 = vsel %vm1354_vm7, %v1338_v57, %v858_v59  ;;  %v721_v43 = vsel %vm266_vm0, %v719_v14, %v720_v56 }
 0x1d9   : > { %1174 = vrot.lane.b32.xlu1 %v4328_v42, %s2497_s28  ;;  %v1339_v26 = vsel %vm1321_vm6, %v1306_v38, %v759_v53 }
 0x1da   : > { %1075 = vrot.lane.b32.xlu0 %v4329_v24, %s2496_s26 }
 0x1db   : > { %v860_v37 = vpop.permute.xlu1 %859 }
 0x1dc   : > { %v1157_v19 = vpop.permute.xlu0 %1156  ;;  %v1372_v2 = vsel %vm1354_vm7, %v1339_v26, %v860_v37 }
 0x1dd   : > { %v1469_v21 = vsel %vm1453_vm10, %v1436_v28, %v1157_v19  ;;  %877 = vrot.lane.b32.xlu1 %v4328_v42, %s2494_s8  ;;  %v820_v28 = vrot.slane %v212_v60, 2  ;;  %v821_v19 = vrot.slane %v213_v63, 2 }
 0x1de   : > { %778 = vrot.lane.b32.xlu0 %v4329_v24, %s2493_s3  ;;  %2288 = vmatmul.mubr.msk.f32.gmra.mrb[14].mxu0 %vm1491_vm11, %v1469_v21  ;;  %v214_v24 = vld [vmem:[%s2574_s27 + $0x190] sm:$0x3] }
 0x1df   : > { %v659_v5 = vpop.permute.xlu1 %658 }
 0x1e0   : > { %v956_v49 = vpop.permute.xlu0 %955  ;;  %v1307_v53 = vsel %vm1288_vm5, %v3381_v45, %v659_v5  ;;  %v722_v45 = vrot.slane %v214_v24, 1 }
 0x1e1   : > { %879 = vrot.lane.b32.xlu1 %v4330_v7, %s2494_s8  ;;  %v1404_v39 = vsel %vm1387_vm8, %v1371_v27, %v956_v49 }
 0x1e2   : > { %1176 = vrot.lane.b32.xlu0 %v4330_v7, %s2497_s28 }
 0x1e3   : > { %v1058_v54 = vpop.permute.xlu1 %1057 }
 0x1e4   : > { %v958_v44 = vpop.permute.xlu0 %957  ;;  %v1437_v48 = vsel %vm1420_vm9, %v1404_v39, %v1058_v54  ;;  %v822_v54 = vsel %vm443_vm1, %v820_v28, %v821_v19 }
 0x1e5   : > { %678 = vrot.lane.b32.xlu1 %v2408_v33, %s2492_s30  ;;  %v1405_v16 = vsel %vm1387_vm8, %v1372_v2, %v958_v44 }
 0x1e6   : > { %975 = vrot.lane.b32.xlu0 %v2408_v33, %s2495_s23  ;;  %v723_v33 = vsel %vm266_vm0, %v720_v56, %v722_v45 }
 0x1e7   : > { %v761_v46 = vpop.permute.xlu1 %760 }
 0x1e8   : > { %v3882_v3 = vpop.permute.xlu0 %660  ;;  %v1340_v42 = vsel %vm1321_vm6, %v1307_v53, %v761_v46 }
 0x1e9   : > { %1077 = vrot.lane.b32.xlu1 %v4331_v4, %s2496_s26  ;;  %v1308_v40 = vsel %vm1288_vm5, %v3378_v0, %v3882_v3 }
 0x1ea   : > { %977 = vrot.lane.b32.xlu0 %v2409_v31, %s2495_s23 }
 0x1eb   : > { %v1159_v41 = vpop.permute.xlu1 %1158 }
 0x1ec   : > { %v1060_v8 = vpop.permute.xlu0 %1059  ;;  %v1470_v6 = vsel %vm1453_vm10, %v1437_v48, %v1159_v41 }
 0x1ed   : > { %780 = vrot.lane.b32.xlu1 %v4331_v4, %s2493_s3  ;;  %2290 = vmatprep.mubr.msk.f32.mxu1 %vm1491_vm11, %v1470_v6  ;;  %v1438_v12 = vsel %vm1420_vm9, %v1405_v16, %v1060_v8  ;;  %v823_v4 = vrot.slane %v214_v24, 2  ;;  %v216_v6 = vld [vmem:[%s2574_s27 + $0x1a0] sm:$0xff] }
 0x1ee   : > { %680 = vrot.lane.b32.xlu0 %v2409_v31, %s2492_s30  ;;  %v1021_v26 = vrot.slane %v216_v6, 1 }
 0x1ef   : > { %v862_v20 = vpop.permute.xlu1 %861  ;;  %v824_v3 = vsel %vm443_vm1, %v821_v19, %v823_v4 }
 0x1f0   : > { %v763_v11 = vpop.permute.xlu0 %762  ;;  %v1373_v9 = vsel %vm1354_vm7, %v1340_v42, %v862_v20  ;;  %v217_v20 = vld [vmem:[%s2574_s27 + $0x1a8] sm:$0x3] }
 0x1f1   : > { %1178 = vrot.lane.b32.xlu1 %v4332_v22, %s2497_s28  ;;  %v1341_v57 = vsel %vm1321_vm6, %v1308_v40, %v763_v11  ;;  %v215_v11 = vld [vmem:[%s2574_s27 + $0x198] sm:$0xff]  ;;  %s153_s27 = sand.u32 1, %s2472_s10  }
 0x1f2   : > { %1079 = vrot.lane.b32.xlu0 %v4333_v58, %s2496_s26  ;;  %s2180_s29 = sshll.u32 %s153_s27, 1 }
 0x1f3   : > { %v864_v17 = vpop.permute.xlu1 %863 }
 0x1f4   : > { %v1161_v13 = vpop.permute.xlu0 %1160  ;;  %v1374_v27 = vsel %vm1354_vm7, %v1341_v57, %v864_v17  ;;  %v1122_v17 = vrot.slane %v216_v6, 2 }
 0x1f5   : > { %v1471_v23 = vsel %vm1453_vm10, %v1438_v12, %v1161_v13  ;;  %881 = vrot.lane.b32.xlu1 %v4332_v22, %s2494_s8  ;;  %v1023_v22 = vrot.slane %v217_v20, 1  ;;  %v1124_v13 = vrot.slane %v217_v20, 2 }
 0x1f6   : > { %782 = vrot.lane.b32.xlu0 %v4333_v58, %s2493_s3  ;;  %2291 = vmatmul.mubr.msk.f32.vlgmr.msra.gmra.mrb[0].mxu1 %vm1491_vm11, %v1471_v23  ;;  %v1020_v58 = vrot.slane %v215_v11, 1 }
 0x1f7   : > { %v3912_v50 = vpop.permute.xlu1 %662  ;;  %v1024_v12 = vsel %vm266_vm0, %v1021_v26, %v1023_v22 }
 0x1f8   : > { %v960_v34 = vpop.permute.xlu0 %959  ;;  %v1309_v23 = vsel %vm1288_vm5, %v3397_v10, %v3912_v50 }
 0x1f9   : > { %883 = vrot.lane.b32.xlu1 %v4334_v52, %s2494_s8  ;;  %v1406_v37 = vsel %vm1387_vm8, %v1373_v9, %v960_v34  ;;  %v1022_v34 = vsel %vm266_vm0, %v1020_v58, %v1021_v26 }
 0x1fa   : > { %1180 = vrot.lane.b32.xlu0 %v4334_v52, %s2497_s28 }
 0x1fb   : > { %v1062_v36 = vpop.permute.xlu1 %1061 }
 0x1fc   : > { %v962_v59 = vpop.permute.xlu0 %961  ;;  %v1439_v21 = vsel %vm1420_vm9, %v1406_v37, %v1062_v36 }
 0x1fd   : > { %682 = vrot.lane.b32.xlu1 %v212_v60, %s2492_s30  ;;  %v1407_v39 = vsel %vm1387_vm8, %v1374_v27, %v962_v59  ;;  %v1125_v59 = vsel %vm443_vm1, %v1122_v17, %v1124_v13 }
 0x1fe   : > { %979 = vrot.lane.b32.xlu0 %v212_v60, %s2495_s23  ;;  %v1121_v60 = vrot.slane %v215_v11, 2 }
 0x1ff   : > { %v765_v18 = vpop.permute.xlu1 %764 }
 0x200   : > { %v3926_v62 = vpop.permute.xlu0 %664  ;;  %v1342_v52 = vsel %vm1321_vm6, %v1309_v23, %v765_v18  ;;  %v1123_v50 = vsel %vm443_vm1, %v1121_v60, %v1122_v17 }
 0x201   : > { %1081 = vrot.lane.b32.xlu1 %v721_v43, %s2496_s26 }
 0x202   : > { %981 = vrot.lane.b32.xlu0 %v213_v63, %s2495_s23 }
 0x203   : > { %v1163_v49 = vpop.permute.xlu1 %1162 }
 0x204   : > { %v1472_v5 = vsel %vm1453_vm10, %v1439_v21, %v1163_v49  ;;  %v1064_v7 = vpop.permute.xlu0 %1063  ;;  %v1310_v21 = vsel %vm1288_vm5, %v3394_v32, %v3926_v62 }
 0x205   : > { %784 = vrot.lane.b32.xlu1 %v721_v43, %s2493_s3  ;;  %2293 = vmatprep.mubr.msk.f32.mxu1 %vm1491_vm11, %v1472_v5  ;;  %v1440_v48 = vsel %vm1420_vm9, %v1407_v39, %v1064_v7 }
 0x206   : > { %684 = vrot.lane.b32.xlu0 %v213_v63, %s2492_s30  ;;  %s2216_s30 = sshll.u32 %s2480_s12, 5  ;;  %s2498_s12 = smov [#allocation2]  }
 0x207   : > { %v866_v44 = vpop.permute.xlu1 %865  ;;  %s4072_s7 = scalar_lea.hbm %s4121_s2, %s2216_s30  ;;  %s2414_s16 = sshll.u32 %s2498_s12, 4  ;;  %s2415_s16 = int_to_ptr.vmem [resolvable:$false] %s2414_s16 }
 0x208   : > { %v767_v46 = vpop.permute.xlu0 %766  ;;  %v1375_v56 = vsel %vm1354_vm7, %v1342_v52, %v866_v44  ;;  %s2416_s18 = scalar_lea.vmem %s2415_s16, 64 }
 0x209   : > { %1182 = vrot.lane.b32.xlu1 %v822_v54, %s2497_s28  ;;  %v1343_v45 = vsel %vm1321_vm6, %v1310_v21, %v767_v46 }
 0x20a   : > { %1083 = vrot.lane.b32.xlu0 %v723_v33, %s2496_s26 }
 0x20b   : > { %v868_v31 = vpop.permute.xlu1 %867 }
 0x20c   : > { %v1165_v41 = vpop.permute.xlu0 %1164  ;;  %v1376_v7 = vsel %vm1354_vm7, %v1343_v45, %v868_v31 }
 0x20d   : > { %v1473_v0 = vsel %vm1453_vm10, %v1440_v48, %v1165_v41  ;;  %885 = vrot.lane.b32.xlu1 %v822_v54, %s2494_s8 }
 0x20e   : > { %786 = vrot.lane.b32.xlu0 %v723_v33, %s2493_s3  ;;  %2294 = vmatmul.mubr.msk.f32.gmra.mrb[2].mxu1 %vm1491_vm11, %v1473_v0  ;;  %s155_s3 = scalar_lea.vmem [#allocation2], %s2180_s29 }
 0x20f   : > { %v667_v8 = vpop.permute.xlu1 %666  ;;  %s2107_s4 = sshll.u32 %s155_s3, 4  ;;  %s4074_s4 = int_to_ptr.vmem [resolvable:$true] %s2107_s4 }
 0x210   : > { %v964_v38 = vpop.permute.xlu0 %963  ;;  %v1311_v62 = vsel %vm1288_vm5, %v3413_v51, %v667_v8  ;;  %s2410_s15 = scalar_lea.vmem %s4074_s4, 32  ;;  %p2417_p1 = scmp.lt.s32.totalorder %s4074_s4, %s2415_s16 }
 0x211   : > { %887 = vrot.lane.b32.xlu1 %v824_v3, %s2494_s8  ;;  %v1408_v36 = vsel %vm1387_vm8, %v1375_v56, %v964_v38  ;;  %s2093_s8 = scalar_lea.sflag [#allocation3], %s153_s27  ;;  %p2411_p12 = scmp.ne.s32.totalorder %s4074_s4, %s2410_s15 }
 0x212   : > { %1184 = vrot.lane.b32.xlu0 %v824_v3, %s2497_s28  ;;  %p2418_p2 = scmp.lt.s32.totalorder %s2416_s18, %s2410_s15 }
 0x213   : > { %v1066_v2 = vpop.permute.xlu1 %1065  ;;  %p2412_p13 = pnand %p2411_p12, %p2554_p4 }
 0x214   : > { %v966_v16 = vpop.permute.xlu0 %965  ;;  %v1441_v43 = vsel %vm1420_vm9, %v1408_v36, %v1066_v2  ;;  %p2419_p3 = por %p2418_p2, %p2417_p1 }
 0x215   : > { %985 = vrot.lane.b32.xlu1 %v216_v6, %s2495_s23  ;;  %v1409_v54 = vsel %vm1387_vm8, %v1376_v7, %v966_v16  ;;  %p2413_p0 = pneg %p2412_p13 }
 0x216   : > { %983 = vrot.lane.b32.xlu0 %v215_v11, %s2495_s23 }
 0x217   : > { %v769_v63 = vpop.permute.xlu1 %768  ;;  %p2420_p5 = pnand %p2419_p3, %p2413_p0 }
 0x218   : > { %v669_v14 = vpop.permute.xlu0 %668  ;;  %v1344_v31 = vsel %vm1321_vm6, %v1311_v62, %v769_v63 }
 0x219   : > { %1087 = vrot.lane.b32.xlu1 %v1024_v12, %s2496_s26  ;;  %v1312_v12 = vsel %vm1288_vm5, %v3410_v29, %v669_v14 }
 0x21a   : > { %1085 = vrot.lane.b32.xlu0 %v1022_v34, %s2496_s26 }
 0x21b   : > { %v1167_v10 = vpop.permute.xlu1 %1166 }
 0x21c   : > { %v1474_v53 = vsel %vm1453_vm10, %v1441_v43, %v1167_v10  ;;  %v1068_v42 = vpop.permute.xlu0 %1067 }
 0x21d   : > { %v2268_v18 = vpop.f32.mrb[0].mxu0  ;;  %1188 = vrot.lane.b32.xlu1 %v1125_v59, %s2497_s28  ;;  %2296 = vmatprep.mubr.msk.f32.mxu1 %vm1491_vm11, %v1474_v53  ;;  %v1442_v33 = vsel %vm1420_vm9, %v1409_v54, %v1068_v42 }
 0x21e   : > { %v2023_v24 = vmul.f32 %v2268_v18, %v2268_v18  ;;  %v1658_v9 = vpop.f32.mrb[1].mxu0  ;;  %1186 = vrot.lane.b32.xlu0 %v1123_v50, %s2497_s28 }
 0x21f   : > { %v1984_v37 = vadd.f32 %v2268_v18, %v1658_v9  ;;  %v2022_v28 = vmul.f32 %v1658_v9, %v1658_v9  ;;  %v870_v19 = vpop.permute.xlu1 %869 }
 0x220   : > { %v771_v49 = vpop.permute.xlu0 %770  ;;  %v1377_v41 = vsel %vm1354_vm7, %v1344_v31, %v870_v19 }
 0x221   : > { %v2054_v5 = vadd.f32 %v2023_v24, %v2022_v28  ;;  %v1345_v23 = vsel %vm1321_vm6, %v1312_v12, %v771_v49 }
 0x223   : > { %v872_v44 = vpop.permute.xlu1 %871 }
 0x224   : > { %v1169_v40 = vpop.permute.xlu0 %1168  ;;  %v1378_v60 = vsel %vm1354_vm7, %v1345_v23, %v872_v44 }
 0x225   : > { %v1475_v57 = vsel %vm1453_vm10, %v1442_v33, %v1169_v40 }
 0x226   : > { %2297 = vmatmul.mubr.msk.f32.gmra.mrb[4].mxu1 %vm1491_vm11, %v1475_v57 }
 0x227   : > { %v671_v27 = vpop.permute.xlu1 %670 }
 0x228   : > { %v968_v4 = vpop.permute.xlu0 %967  ;;  %v1313_v53 = vsel %vm1288_vm5, %v3429_v25, %v671_v27 }
 0x229   : > { %v1410_v3 = vsel %vm1387_vm8, %v1377_v41, %v968_v4 }
 0x22b   : > { %v1070_v39 = vpop.permute.xlu1 %1069 }
 0x22c   : > { %v970_v32 = vpop.permute.xlu0 %969  ;;  %v1443_v20 = vsel %vm1420_vm9, %v1410_v3, %v1070_v39 }
 0x22d   : > { %v1411_v63 = vsel %vm1387_vm8, %v1378_v60, %v970_v32 }
 0x22f   : > { %v773_v46 = vpop.permute.xlu1 %772 }
 0x230   : > { %v673_v48 = vpop.permute.xlu0 %672  ;;  %v1346_v9 = vsel %vm1321_vm6, %v1313_v53, %v773_v46 }
 0x231   : > { %v2271_v0 = vpop.f32.mrb[2].mxu0  ;;  %v1314_v40 = vsel %vm1288_vm5, %v3426_v55, %v673_v48 }
 0x232   : > { %v1668_v6 = vpop.f32.mrb[3].mxu0  ;;  %v2025_v58 = vmul.f32 %v2271_v0, %v2271_v0 }
 0x233   : > { %v1985_v38 = vadd.f32 %v1984_v37, %v1668_v6  ;;  %v2024_v11 = vmul.f32 %v1668_v6, %v1668_v6  ;;  %v1171_v26 = vpop.permute.xlu1 %1170 }
 0x234   : > { %v1476_v22 = vsel %vm1453_vm10, %v1443_v20, %v1171_v26  ;;  %v1072_v2 = vpop.permute.xlu0 %1071 }
 0x235   : > { %v2055_v51 = vadd.f32 %v2054_v5, %v2024_v11  ;;  %2299 = vmatprep.mubr.msk.f32.mxu1 %vm1491_vm11, %v1476_v22  ;;  %v1986_v8 = vadd.f32 %v2271_v0, %v1985_v38  ;;  %v1444_v52 = vsel %vm1420_vm9, %v1411_v63, %v1072_v2 }
 0x237   : > { %v874_v16 = vpop.permute.xlu1 %873  ;;  %v2056_v17 = vadd.f32 %v2055_v51, %v2025_v58 }
 0x238   : > { %v775_v13 = vpop.permute.xlu0 %774  ;;  %v1379_v28 = vsel %vm1354_vm7, %v1346_v9, %v874_v16 }
 0x239   : > { %v1347_v27 = vsel %vm1321_vm6, %v1314_v40, %v775_v13 }
 0x23b   : > { %v876_v34 = vpop.permute.xlu1 %875 }
 0x23c   : > { %v1173_v56 = vpop.permute.xlu0 %1172  ;;  %v1380_v4 = vsel %vm1354_vm7, %v1347_v27, %v876_v34 }
 0x23d   : > { %v1477_v36 = vsel %vm1453_vm10, %v1444_v52, %v1173_v56 }
 0x23e   : > { %2300 = vmatmul.mubr.msk.f32.gmra.mrb[6].mxu1 %vm1491_vm11, %v1477_v36 }
 0x23f   : > { %v675_v59 = vpop.permute.xlu1 %674 }
 0x240   : > { %v972_v43 = vpop.permute.xlu0 %971  ;;  %v1315_v2 = vsel %vm1288_vm5, %v3445_v61, %v675_v59 }
 0x241   : > { %v1412_v45 = vsel %vm1387_vm8, %v1379_v28, %v972_v43 }
 0x243   : > { %v1074_v10 = vpop.permute.xlu1 %1073 }
 0x244   : > { %v974_v50 = vpop.permute.xlu0 %973  ;;  %v1445_v5 = vsel %vm1420_vm9, %v1412_v45, %v1074_v10 }
 0x245   : > { %v2274_v29 = vpop.f32.mrb[4].mxu0  ;;  %v1413_v39 = vsel %vm1387_vm8, %v1380_v4, %v974_v50 }
 0x246   : > { %v1678_v14 = vpop.f32.mrb[5].mxu0  ;;  %v2027_v19 = vmul.f32 %v2274_v29, %v2274_v29 }
 0x247   : > { %v1987_v42 = vadd.f32 %v1986_v8, %v1678_v14  ;;  %v2026_v18 = vmul.f32 %v1678_v14, %v1678_v14  ;;  %v777_v24 = vpop.permute.xlu1 %776 }
 0x248   : > { %v677_v37 = vpop.permute.xlu0 %676  ;;  %v1348_v8 = vsel %vm1321_vm6, %v1315_v2, %v777_v24 }
 0x249   : > { %v2057_v21 = vadd.f32 %v2056_v17, %v2026_v18  ;;  %v1988_v49 = vadd.f32 %v2274_v29, %v1987_v42  ;;  %v1316_v61 = vsel %vm1288_vm5, %v3442_v47, %v677_v37 }
 0x24b   : > { %v1175_v7 = vpop.permute.xlu1 %1174  ;;  %v2058_v54 = vadd.f32 %v2057_v21, %v2027_v19 }
 0x24c   : > { %v1478_v44 = vsel %vm1453_vm10, %v1445_v5, %v1175_v7  ;;  %v1076_v25 = vpop.permute.xlu0 %1075 }
 0x24d   : > { %2302 = vmatprep.mubr.msk.f32.mxu1 %vm1491_vm11, %v1478_v44  ;;  %v1446_v62 = vsel %vm1420_vm9, %v1413_v39, %v1076_v25 }
 0x24f   : > { %v878_v33 = vpop.permute.xlu1 %877 }
 0x250   : > { %v779_v57 = vpop.permute.xlu0 %778  ;;  %v1381_v17 = vsel %vm1354_vm7, %v1348_v8, %v878_v33 }
 0x251   : > { %v1349_v56 = vsel %vm1321_vm6, %v1316_v61, %v779_v57 }
 0x253   : > { %v880_v32 = vpop.permute.xlu1 %879 }
 0x254   : > { %v1177_v46 = vpop.permute.xlu0 %1176  ;;  %v1382_v36 = vsel %vm1354_vm7, %v1349_v56, %v880_v32 }
 0x255   : > { %v1479_v31 = vsel %vm1453_vm10, %v1446_v62, %v1177_v46 }
 0x256   : > { %2303 = vmatmul.mubr.msk.f32.gmra.mrb[8].mxu1 %vm1491_vm11, %v1479_v31 }
 0x257   : > { %v679_v41 = vpop.permute.xlu1 %678 }
 0x258   : > { %v976_v0 = vpop.permute.xlu0 %975  ;;  %v1317_v45 = vsel %vm1288_vm5, %v3461_v1, %v679_v41 }
 0x259   : > { %v2277_v3 = vpop.f32.mrb[6].mxu0  ;;  %v1414_v12 = vsel %vm1387_vm8, %v1381_v17, %v976_v0 }
 0x25a   : > { %v1688_v6 = vpop.f32.mrb[7].mxu0  ;;  %v2029_v11 = vmul.f32 %v2277_v3, %v2277_v3 }
 0x25b   : > { %v1989_v55 = vadd.f32 %v1988_v49, %v1688_v6  ;;  %v2028_v48 = vmul.f32 %v1688_v6, %v1688_v6  ;;  %v1078_v20 = vpop.permute.xlu1 %1077 }
 0x25c   : > { %v978_v38 = vpop.permute.xlu0 %977  ;;  %v1447_v13 = vsel %vm1420_vm9, %v1414_v12, %v1078_v20 }
 0x25d   : > { %v2059_v26 = vadd.f32 %v2058_v54, %v2028_v48  ;;  %v1990_v22 = vadd.f32 %v2277_v3, %v1989_v55  ;;  %v1415_v59 = vsel %vm1387_vm8, %v1382_v36, %v978_v38 }
 0x25f   : > { %v781_v58 = vpop.permute.xlu1 %780  ;;  %v2060_v51 = vadd.f32 %v2059_v26, %v2029_v11 }
 0x260   : > { %v681_v16 = vpop.permute.xlu0 %680  ;;  %v1350_v7 = vsel %vm1321_vm6, %v1317_v45, %v781_v58 }
 0x261   : > { %v1318_v1 = vsel %vm1288_vm5, %v3458_v35, %v681_v16 }
 0x263   : > { %v1179_v23 = vpop.permute.xlu1 %1178 }
 0x264   : > { %v1480_v60 = vsel %vm1453_vm10, %v1447_v13, %v1179_v23  ;;  %v1080_v63 = vpop.permute.xlu0 %1079 }
 0x265   : > { %2305 = vmatprep.mubr.msk.f32.mxu1 %vm1491_vm11, %v1480_v60  ;;  %v1448_v10 = vsel %vm1420_vm9, %v1415_v59, %v1080_v63 }
 0x267   : > { %v882_v34 = vpop.permute.xlu1 %881 }
 0x268   : > { %v783_v52 = vpop.permute.xlu0 %782  ;;  %v1383_v44 = vsel %vm1354_vm7, %v1350_v7, %v882_v34 }
 0x269   : > { %v1351_v32 = vsel %vm1321_vm6, %v1318_v1, %v783_v52 }
 0x26b   : > { %v884_v43 = vpop.permute.xlu1 %883 }
 0x26c   : > { %v1181_v50 = vpop.permute.xlu0 %1180  ;;  %v1384_v46 = vsel %vm1354_vm7, %v1351_v32, %v884_v43 }
 0x26d   : > { %v1481_v29 = vsel %vm1453_vm10, %v1448_v10, %v1181_v50  ;;  %v2280_v14 = vpop.f32.mrb[8].mxu0 }
 0x26e   : > { %v1698_v53 = vpop.f32.mrb[9].mxu0  ;;  %2306 = vmatmul.mubr.msk.f32.gmra.mrb[10].mxu1 %vm1491_vm11, %v1481_v29  ;;  %v2031_v9 = vmul.f32 %v2280_v14, %v2280_v14 }
 0x26f   : > { %v1991_v42 = vadd.f32 %v1990_v22, %v1698_v53  ;;  %v2030_v18 = vmul.f32 %v1698_v53, %v1698_v53  ;;  %v683_v47 = vpop.permute.xlu1 %682 }
 0x270   : > { %v980_v24 = vpop.permute.xlu0 %979  ;;  %v1319_v8 = vsel %vm1288_vm5, %v3477_v30, %v683_v47 }
 0x271   : > { %v2061_v37 = vadd.f32 %v2060_v51, %v2030_v18  ;;  %v1992_v28 = vadd.f32 %v2280_v14, %v1991_v42  ;;  %v1416_v25 = vsel %vm1387_vm8, %v1383_v44, %v980_v24 }
 0x273   : > { %v1082_v19 = vpop.permute.xlu1 %1081  ;;  %v2062_v21 = vadd.f32 %v2061_v37, %v2031_v9 }
 0x274   : > { %v982_v49 = vpop.permute.xlu0 %981  ;;  %v1449_v33 = vsel %vm1420_vm9, %v1416_v25, %v1082_v19 }
 0x275   : > { %v1417_v41 = vsel %vm1387_vm8, %v1384_v46, %v982_v49 }
 0x277   : > { %v785_v5 = vpop.permute.xlu1 %784 }
 0x278   : > { %v685_v54 = vpop.permute.xlu0 %684  ;;  %v1352_v12 = vsel %vm1321_vm6, %v1319_v8, %v785_v5 }
 0x279   : > { %v1320_v58 = vsel %vm1288_vm5, %v3474_v15, %v685_v54 }
 0x27b   : > { %v1183_v40 = vpop.permute.xlu1 %1182 }
 0x27c   : > { %v1482_v57 = vsel %vm1453_vm10, %v1449_v33, %v1183_v40  ;;  %v1084_v27 = vpop.permute.xlu0 %1083 }
 0x27d   : > { %2308 = vmatprep.mubr.msk.f32.mxu1 %vm1491_vm11, %v1482_v57  ;;  %v1450_v55 = vsel %vm1420_vm9, %v1417_v41, %v1084_v27 }
 0x27f   : > { %v886_v4 = vpop.permute.xlu1 %885 }
 0x280   : > { %v787_v39 = vpop.permute.xlu0 %786  ;;  %v1385_v23 = vsel %vm1354_vm7, %v1352_v12, %v886_v4 }
 0x281   : > { %v2283_v62 = vpop.f32.mrb[10].mxu0  ;;  %v1353_v16 = vsel %vm1321_vm6, %v1320_v58, %v787_v39 }
 0x282   : > { %v1708_v31 = vpop.f32.mrb[11].mxu0  ;;  %v2033_v20 = vmul.f32 %v2283_v62, %v2283_v62 }
 0x283   : > { %v1993_v0 = vadd.f32 %v1992_v28, %v1708_v31  ;;  %v2032_v3 = vmul.f32 %v1708_v31, %v1708_v31  ;;  %v888_v6 = vpop.permute.xlu1 %887 }
 0x284   : > { %v1185_v48 = vpop.permute.xlu0 %1184  ;;  %v1386_v13 = vsel %vm1354_vm7, %v1353_v16, %v888_v6 }
 0x285   : > { %v2063_v38 = vadd.f32 %v2062_v21, %v2032_v3  ;;  %v1483_v11 = vsel %vm1453_vm10, %v1450_v55, %v1185_v48  ;;  %v1994_v35 = vadd.f32 %v2283_v62, %v1993_v0 }
 0x286   : > { %2309 = vmatmul.mubr.msk.f32.gmra.mrb[12].mxu1 %vm1491_vm11, %v1483_v11 }
 0x287   : > { %v986_v26 = vpop.permute.xlu1 %985  ;;  %v2064_v22 = vadd.f32 %v2063_v38, %v2033_v20 }
 0x288   : > { %v984_v2 = vpop.permute.xlu0 %983  ;;  %v1419_v60 = vsel %vm1387_vm8, %v1386_v13, %v986_v26 }
 0x289   : > { %v1418_v63 = vsel %vm1387_vm8, %v1385_v23, %v984_v2 }
 0x28b   : > { %v1088_v51 = vpop.permute.xlu1 %1087 }
 0x28c   : > { %v1086_v17 = vpop.permute.xlu0 %1085  ;;  %v1452_v34 = vsel %vm1420_vm9, %v1419_v60, %v1088_v51 }
 0x28d   : > { %v1451_v61 = vsel %vm1420_vm9, %v1418_v63, %v1086_v17 }
 0x28f   : > { %v1189_v15 = vpop.permute.xlu1 %1188 }
 0x290   : > { %v1485_v30 = vsel %vm1453_vm10, %v1452_v34, %v1189_v15  ;;  %v1187_v52 = vpop.permute.xlu0 %1186 }
 0x291   : > { %v1484_v56 = vsel %vm1453_vm10, %v1451_v61, %v1187_v52 }
 0x292   : > { %2311 = vmatprep.mubr.msk.f32.mxu1 %vm1491_vm11, %v1484_v56 }
 0x293   : > { %2312 = vmatmul.mubr.msk.f32.gmra.mrb[14].mxu1 %vm1491_vm11, %v1485_v30 }
 0x299   : > { %v2286_v36 = vpop.f32.mrb[12].mxu0 }
 0x29a   : > { %v1718_v59 = vpop.f32.mrb[13].mxu0  ;;  %v2035_v50 = vmul.f32 %v2286_v36, %v2286_v36 }
 0x29b   : > { %v1995_v43 = vadd.f32 %v1994_v35, %v1718_v59  ;;  %v2034_v10 = vmul.f32 %v1718_v59, %v1718_v59 }
 0x29d   : > { %v2065_v29 = vadd.f32 %v2064_v22, %v2034_v10  ;;  %v1996_v14 = vadd.f32 %v2286_v36, %v1995_v43 }
 0x29f   : > { %v2066_v53 = vadd.f32 %v2065_v29, %v2035_v50 }
 0x2b1   : > { %v2289_v42 = vpop.f32.mrb[14].mxu0 }
 0x2b2   : > { %v1728_v18 = vpop.f32.mrb[15].mxu0  ;;  %v2037_v9 = vmul.f32 %v2289_v42, %v2289_v42 }
 0x2b3   : > { %v1997_v47 = vadd.f32 %v1996_v14, %v1728_v18  ;;  %v2036_v24 = vmul.f32 %v1728_v18, %v1728_v18 }
 0x2b5   : > { %v1998_v37 = vadd.f32 %v2289_v42, %v1997_v47  ;;  %v2067_v28 = vadd.f32 %v2066_v53, %v2036_v24 }
 0x2b7   : > { %v2068_v19 = vadd.f32 %v2067_v28, %v2037_v9 }
 0x2c9   : > { %v2292_v21 = vpop.f32.mrb[0].mxu1 }
 0x2ca   : > { %v1738_v49 = vpop.f32.mrb[1].mxu1  ;;  %v2039_v7 = vmul.f32 %v2292_v21, %v2292_v21 }
 0x2cb   : > { %v1999_v45 = vadd.f32 %v1998_v37, %v1738_v49  ;;  %v2038_v5 = vmul.f32 %v1738_v49, %v1738_v49 }
 0x2cd   : > { %v2069_v54 = vadd.f32 %v2068_v19, %v2038_v5  ;;  %v2000_v44 = vadd.f32 %v2292_v21, %v1999_v45 }
 0x2cf   : > { %v2070_v25 = vadd.f32 %v2069_v54, %v2039_v7 }
 0x2e1   : > { %v2295_v33 = vpop.f32.mrb[2].mxu1 }
 0x2e2   : > { %v1748_v40 = vpop.f32.mrb[3].mxu1  ;;  %v2041_v4 = vmul.f32 %v2295_v33, %v2295_v33 }
 0x2e3   : > { %v2001_v57 = vadd.f32 %v2000_v44, %v1748_v40  ;;  %v2040_v27 = vmul.f32 %v1748_v40, %v1748_v40 }
 0x2e5   : > { %v2071_v1 = vadd.f32 %v2070_v25, %v2040_v27  ;;  %v2002_v39 = vadd.f32 %v2295_v33, %v2001_v57 }
 0x2e7   : > { %v2072_v32 = vadd.f32 %v2071_v1, %v2041_v4 }
 0x2f9   : > { %v2298_v62 = vpop.f32.mrb[4].mxu1 }
 0x2fa   : > { %v1758_v46 = vpop.f32.mrb[5].mxu1  ;;  %v2043_v0 = vmul.f32 %v2298_v62, %v2298_v62 }
 0x2fb   : > { %v2003_v31 = vadd.f32 %v2002_v39, %v1758_v46  ;;  %v2042_v41 = vmul.f32 %v1758_v46, %v1758_v46 }
 0x2fd   : > { %v2073_v3 = vadd.f32 %v2072_v32, %v2042_v41  ;;  %v2004_v6 = vadd.f32 %v2298_v62, %v2003_v31 }
 0x2ff   : > { %v2074_v55 = vadd.f32 %v2073_v3, %v2043_v0 }
 0x311   : > { %v2301_v48 = vpop.f32.mrb[6].mxu1 }
 0x312   : > { %v1768_v20 = vpop.f32.mrb[7].mxu1  ;;  %v2045_v35 = vmul.f32 %v2301_v48, %v2301_v48 }
 0x313   : > { %v2005_v38 = vadd.f32 %v2004_v6, %v1768_v20  ;;  %v2044_v11 = vmul.f32 %v1768_v20, %v1768_v20 }
 0x315   : > { %v2075_v26 = vadd.f32 %v2074_v55, %v2044_v11  ;;  %v2006_v22 = vadd.f32 %v2301_v48, %v2005_v38 }
 0x317   : > { %v2076_v2 = vadd.f32 %v2075_v26, %v2045_v35 }
 0x329   : > { %v2304_v58 = vpop.f32.mrb[8].mxu1 }
 0x32a   : > { %v1778_v51 = vpop.f32.mrb[9].mxu1  ;;  %v2047_v17 = vmul.f32 %v2304_v58, %v2304_v58 }
 0x32b   : > { %v2007_v8 = vadd.f32 %v2006_v22, %v1778_v51  ;;  %v2046_v16 = vmul.f32 %v1778_v51, %v1778_v51 }
 0x32d   : > { %v2077_v12 = vadd.f32 %v2076_v2, %v2046_v16  ;;  %v2008_v13 = vadd.f32 %v2304_v58, %v2007_v8 }
 0x32f   : > { %v2078_v23 = vadd.f32 %v2077_v12, %v2047_v17 }
 0x341   : > { %v2307_v60 = vpop.f32.mrb[10].mxu1 }
 0x342   : > { %v1788_v63 = vpop.f32.mrb[11].mxu1  ;;  %v2049_v61 = vmul.f32 %v2307_v60, %v2307_v60 }
 0x343   : > { %v2009_v34 = vadd.f32 %v2008_v13, %v1788_v63  ;;  %v2048_v15 = vmul.f32 %v1788_v63, %v1788_v63 }
 0x345   : > { %v2079_v30 = vadd.f32 %v2078_v23, %v2048_v15  ;;  %v2010_v52 = vadd.f32 %v2307_v60, %v2009_v34 }
 0x347   : > { %v2080_v56 = vadd.f32 %v2079_v30, %v2049_v61 }
 0x359   : > { %v2310_v36 = vpop.f32.mrb[12].mxu1 }
 0x35a   : > { %v1798_v59 = vpop.f32.mrb[13].mxu1  ;;  %v2051_v50 = vmul.f32 %v2310_v36, %v2310_v36 }
 0x35b   : > { %v2011_v43 = vadd.f32 %v2010_v52, %v1798_v59  ;;  %v2050_v10 = vmul.f32 %v1798_v59, %v1798_v59 }
 0x35d   : > { %v2081_v29 = vadd.f32 %v2080_v56, %v2050_v10  ;;  %v2012_v14 = vadd.f32 %v2310_v36, %v2011_v43 }
 0x35f   : > { %v2082_v53 = vadd.f32 %v2081_v29, %v2051_v50 }
 0x366   : > { %v2313_v42 = vpop.f32.mrb[14].mxu1 }
 0x367   : > { %v1808_v18 = vpop.f32.mrb[15].mxu1  ;;  %v2053_v9 = vmul.f32 %v2313_v42, %v2313_v42 }
 0x368   : > { %v2013_v47 = vadd.f32 %v2012_v14, %v1808_v18  ;;  %v2052_v24 = vmul.f32 %v1808_v18, %v1808_v18 }
 0x36a   : > { %v2014_v37 = vadd.f32 %v2313_v42, %v2013_v47  ;;  %v2083_v28 = vadd.f32 %v2082_v53, %v2052_v24 }
 0x36c   : > { %v2015_v19 = vrot.slane %v2014_v37, 4  ;;  %v2084_v21 = vadd.f32 %v2083_v28, %v2053_v9 }
 0x36e   : > { %v2016_v49 = vadd.f32 %v2015_v19, %v2014_v37  ;;  %v2085_v45 = vrot.slane %v2084_v21, 4 }
 0x370   : > { %v2017_v5 = vrot.slane %v2016_v49, 2  ;;  %v2086_v7 = vadd.f32 %v2085_v45, %v2084_v21 }
 0x372   : > { %v2018_v54 = vadd.f32 %v2017_v5, %v2016_v49  ;;  %v2087_v44 = vrot.slane %v2086_v7, 2 }
 0x374   : > { %v2019_v25 = vrot.slane %v2018_v54, 1  ;;  %v2088_v33 = vadd.f32 %v2087_v44, %v2086_v7 }
 0x376   : > { %v2020_v40 = vadd.f32 %v2019_v25, %v2018_v54  ;;  %v2089_v57 = vrot.slane %v2088_v33, 1 }
 0x378   : > { %2021 = vst [vmem:[%s155_s3] sm:$0x1] %v2020_v40  ;;  %v2090_v27 = vadd.f32 %v2089_v57, %v2088_v33 }
 0x37a   : > { %2091 = vst [vmem:[%s155_s3 + $0x1] sm:$0x1] %v2090_v27 }
 0x37b   : > { %2423 = shalt.err (!%p2420_p5)
}
 0x37c   : > { %s2424_s20 = scalar_lea.hbm %s4072_s7, 32  ;;  %s2428_s25 = scalar_lea.hbm %s4121_s2, 64 }
 0x37d   : > { %p2425_p6 = scmp.ne.s32.totalorder %s4072_s7, %s2424_s20  ;;  %p2429_p10 = scmp.lt.u32.totalorder %s4072_s7, %s4121_s2 }
 0x37e   : > { %p2430_p11 = scmp.lt.u32.totalorder %s2428_s25, %s2424_s20  ;;  %p2432_p13 = scmp.lt.u32.totalorder %s2424_s20, %s4072_s7 }
 0x37f   : > { %p2426_p7 = pnand %p2425_p6, %p2554_p4 }
 0x380   : > { %p2431_p12 = por %p2430_p11, %p2429_p10 }
 0x381   : > { %p2427_p9 = pneg %p2426_p7 }
 0x382   : > { %p2433_p0 = por %p2432_p13, %p2431_p12 }
 0x384   : > { %p2434_p1 = pnand %p2433_p0, %p2427_p9 }
 0x386   : > { %2437 = shalt.err (!%p2434_p1)
}
 0x387   : > { %2329 = dma.vmem_to_hbm [thread:$0]  (%p2554_p4), %s4074_s4, 32, %s4072_s7, %s2093_s8  }
 0x388 PF: > { %p2335_p2 = scmp.ge.s32.totalorder %s2488_s14, 2  ;;  %s2119_s27 = sand.u32 1, %s2468_s9  }
 0x389   : > { %s2120_s29 = scalar_lea.sflag [#allocation3], %s2119_s27 }
 0x38a   : > { %p2332_p3 = pnand %p2335_p2, %p2561_p8 }
 0x38c   : > { %2463 = dma.done.wait (!%p2332_p3), %s2120_s29, 32  }
 0x38d   : > { %2465 = vsyncadd (!%p2332_p3), %s2120_s29, 4294967264  ;;  %s15_s14 = sadd.s32 1, %s2488_s14   ;;  %s4335_s9 = smov %s2472_s10 }
 0x38e   : > { %p12_p5 = scmp.ge.s32.totalorder %s15_s14, 4   ;;  %s4336_s10 = smov %s2476_s11 }
 0x38f   : > { %s4337_s11 = smov %s2567_s22  ;;  %s4338_s12 = smov %s2484_s13 }
 0x390   : > { %s4339_s13 = smov %s4341_s17  ;;  %14 = sbr.rel (!%p12_p5) target bundleno = 4 (0x4), region = 63 }
 0x397   :  { %2125 = vsyncpa [#allocation3], 1 }
 0x398   :  { %2127 = vsyncpa [#allocation3 + $0x1], 1 }

</bundles_post_ra>
